<compile_context>
chip_gen: v6e
topology: v6e:2x2x1
jax: 0.10.0
libtpu: 0.0.40
codegen_flags: <defaults>
</compile_context>

<pallas_src>
import functools

import jax
import jax.numpy as jnp
from jax import lax
from jax.experimental import pallas as pl
from jax.experimental.pallas import tpu as pltpu


# ----------------------------------------------------------------------------
# Pallas kernel: whole decode (all T steps) in a single invocation.
# ----------------------------------------------------------------------------
def _caption_decode_kernel(e_ref, h0_ref, wih_ref, whh_ref, bi_ref, bh_ref,
                           wout_ref, bout_ref,
                           logits_ref, seqs_ref, lp_ref,
                           h_scr, gi_scr, hall_scr,
                           *, T, N, E, H, V):
    f32 = jnp.float32
    bf16 = jnp.bfloat16
    H3 = 3 * H

    # (1) Input-side gate pre-activations for ALL steps in one MXU call
    #     (teacher forcing => every step input is known ahead of time).
    e2 = e_ref[...].reshape(T * N, E).astype(bf16)                      # (T*N, E)
    gi = jnp.dot(e2, wih_ref[...], preferred_element_type=f32) + bi_ref[...]
    gi_scr[...] = gi.reshape(T, N, H3)

    # Hidden-side bias broadcast hoisted out of the recurrence loop.
    bh_full = jnp.broadcast_to(bh_ref[...], (N, H3))                    # (N, 3H)

    # (2) Serial GRU recurrence: only one (N,H)@(H,3H) dot + gates per step.
    h_scr[...] = h0_ref[...]

    def step(t, carry):
        h = h_scr[...]                                                  # (N, H) f32
        gh = jnp.dot(h.astype(bf16), whh_ref[...],
                     preferred_element_type=f32) + bh_full              # (N, 3H)
        gi_t = gi_scr[t]                                                # (N, 3H)
        # PyTorch GRU gate order (r, z, n):
        #   r = sigmoid(W_ir x + b_ir + W_hr h + b_hr)       (bias pre-summed into gi)
        #   z = sigmoid(W_iz x + b_iz + W_hz h + b_hz)       (bias pre-summed into gi)
        #   n = tanh   (W_in x + b_in + r * (W_hn h + b_hn)) (b_hn lives in gh)
        r = jax.nn.sigmoid(gi_t[:, :H] + gh[:, :H])
        z = jax.nn.sigmoid(gi_t[:, H:2 * H] + gh[:, H:2 * H])
        n = jnp.tanh(gi_t[:, 2 * H:] + r * gh[:, 2 * H:])
        h_new = (1.0 - z) * n + z * h
        h_scr[...] = h_new
        hall_scr[t] = h_new
        return carry

    lax.fori_loop(0, T, step, 0, unroll=True)

    # (3) Vocab projection + log-softmax stats + greedy argmax, batched over T*N rows.
    h_all = hall_scr[...].reshape(T * N, H)
    logits = jnp.dot(h_all.astype(bf16), wout_ref[...],
                     preferred_element_type=f32) + bout_ref[...]        # (T*N, V)
    logits_ref[...] = logits

    mx = jnp.max(logits, axis=-1, keepdims=True)                        # (T*N, 1)
    lse = jnp.log(jnp.sum(jnp.exp(logits - mx), axis=-1, keepdims=True))
    lp_ref[...] = -lse        # max of log_softmax(logits) == -logsumexp(logits - mx)

    ids = lax.broadcasted_iota(jnp.int32, logits.shape, 1)
    is_max = logits >= mx
    seqs_ref[...] = jnp.min(jnp.where(is_max, ids, V),
                            axis=-1, keepdims=True).astype(jnp.int32)   # first-index argmax


# ----------------------------------------------------------------------------
# Wrapper: parameter fusion + pallas_call.
# ----------------------------------------------------------------------------
def _fuse_decoder_params(params, compute_dtype):
    """Fuse the 3 GRU gate weight matrices / biases (gate order r, z, n)."""
    H = params["W_hh"].shape[-1]
    W_ih = jnp.concatenate([params["W_ih"][0], params["W_ih"][1], params["W_ih"][2]],
                           axis=1).astype(compute_dtype)                # (E, 3H)
    W_hh = jnp.concatenate([params["W_hh"][0], params["W_hh"][1], params["W_hh"][2]],
                           axis=1).astype(compute_dtype)                # (H, 3H)
    # r/z gates: input+hidden biases pre-summed; n gate: b_in on the input side,
    # b_hn must stay on the hidden side (it is multiplied by r).
    b_i = jnp.concatenate([params["b_ih"][0] + params["b_hh"][0],
                           params["b_ih"][1] + params["b_hh"][1],
                           params["b_ih"][2]], axis=-1)                 # (1, 3H) f32
    b_h = jnp.concatenate([jnp.zeros((1, 2 * H), jnp.float32),
                           params["b_hh"][2]], axis=-1)                 # (1, 3H) f32
    W_out = params["W_out"].astype(compute_dtype)                       # (H, V)
    b_out = params["b_out"]                                             # (1, V) f32
    return W_ih, W_hh, b_i, b_h, W_out, b_out


def decode_greedy_train(e_all, h0, params, *, compute_dtype=jnp.bfloat16):
    """e_all: (T, N, E) time-major step inputs (f32); h0: (N, H) f32."""
    T, N, E = e_all.shape
    H = h0.shape[1]
    V = params["W_out"].shape[1]
    H3 = 3 * H

    W_ih, W_hh, b_i, b_h, W_out, b_out = _fuse_decoder_params(params, compute_dtype)

    kernel = functools.partial(_caption_decode_kernel, T=T, N=N, E=E, H=H, V=V)

    flops = (2 * T * N * E * H3 + 2 * T * N * H * H3 + 2 * T * N * H * V
             + 12 * T * N * H + 8 * T * N * V)
    transcendentals = T * N * (3 * H + V + 1)
    bytes_accessed = (T * N * E * 4 + N * H * 4                       # e_all, h0
                      + (E + H) * H3 * 2 + H * V * 2                  # bf16 weights
                      + (2 * H3 + V) * 4                              # biases
                      + T * N * V * 4 + 2 * T * N * 4)                # outputs

    grid_spec = pltpu.PrefetchScalarGridSpec(
        num_scalar_prefetch=0,
        grid=(1,),                                      # single invocation; loop is in-kernel
        in_specs=[
            pl.BlockSpec((T, N, E), lambda i: (0, 0, 0)),   # step inputs (f32)
            pl.BlockSpec((N, H), lambda i: (0, 0)),          # h0 (f32)
            pl.BlockSpec((E, H3), lambda i: (0, 0)),         # fused W_ih (bf16)
            pl.BlockSpec((H, H3), lambda i: (0, 0)),         # fused W_hh (bf16)
            pl.BlockSpec((1, H3), lambda i: (0, 0)),         # fused input-side bias
            pl.BlockSpec((1, H3), lambda i: (0, 0)),         # fused hidden-side bias
            pl.BlockSpec((H, V), lambda i: (0, 0)),          # W_out (bf16)
            pl.BlockSpec((1, V), lambda i: (0, 0)),          # b_out
        ],
        out_specs=[
            pl.BlockSpec((T * N, V), lambda i: (0, 0)),      # logits (lane-dense, V last)
            pl.BlockSpec((T * N, 1), lambda i: (0, 0)),      # greedy ids (single slab store)
            pl.BlockSpec((T * N, 1), lambda i: (0, 0)),      # max logprobs
        ],
        scratch_shapes=[
            pltpu.VMEM((N, H), jnp.float32),        # recurrent hidden state
            pltpu.VMEM((T, N, H3), jnp.float32),    # precomputed input-gate pre-activations
            pltpu.VMEM((T, N, H), jnp.float32),     # all hidden states for batched W_out
        ],
    )
    out_shape = (
        jax.ShapeDtypeStruct((T * N, V), jnp.float32),
        jax.ShapeDtypeStruct((T * N, 1), jnp.int32),
        jax.ShapeDtypeStruct((T * N, 1), jnp.float32),
    )
    logits2, seqs2, lp2 = pl.pallas_call(
        kernel,
        out_shape=out_shape,
        grid_spec=grid_spec,
        compiler_params=pltpu.CompilerParams(
            dimension_semantics=("arbitrary",),
            vmem_limit_bytes=32 * 1024 * 1024,
        ),
        cost_estimate=pl.CostEstimate(flops=flops,
                                      transcendentals=transcendentals,
                                      bytes_accessed=bytes_accessed),
    )(e_all, h0, W_ih, W_hh, b_i, b_h, W_out, b_out)

    return (logits2.reshape(T, N, V),
            seqs2.reshape(T, N),
            lp2.reshape(T, N))


# ----------------------------------------------------------------------------
# Glue: encoder, teacher-forced embedding gather, output dict.
# ----------------------------------------------------------------------------
def _encode(feats, feat_lens, params):
    N, Tf, F = feats.shape
    mask = (jnp.arange(Tf)[None, :] < feat_lens[:, None]).astype(feats.dtype)
    pooled = (feats * mask[:, :, None]).sum(axis=1) / feat_lens[:, None].astype(feats.dtype)
    audio_embeds = pooled @ params["W_enc"] + params["b_enc"]         # (N, E)
    h0 = jnp.tanh(pooled @ params["W_h0"] + params["b_h0"])           # (N, H)
    return audio_embeds, h0


def caption_model_forward(feats, feat_lens, caps, cap_lens, params):
    """Train-mode forward (teacher forcing, greedy bookkeeping), dropout=0."""
    del cap_lens  # caps is padded to max(cap_lens) == caps.shape[1]
    audio_embeds, h0 = _encode(feats, feat_lens, params)
    T = caps.shape[1]

    # step-t input: t==0 -> audio embed; t>0 -> word embedding of caps[:, t-1]
    word_emb = jnp.take(params["emb"], caps, axis=0)                  # (N, T, E)
    e_all = jnp.concatenate([audio_embeds[:, None, :], word_emb[:, :T - 1, :]], axis=1)
    e_all = jnp.transpose(e_all, (1, 0, 2))                           # (T, N, E)

    logits_t, seqs_t, lp_t = decode_greedy_train(e_all, h0, params)
    return {
        "seqs": jnp.transpose(seqs_t),                 # (N, T) int32
        "logits": jnp.transpose(logits_t, (1, 0, 2)),  # (N, T, V)
        "sampled_logprobs": jnp.transpose(lp_t),       # (N, T)
    }


# ----------------------------------------------------------------------------
# Pure-JAX reference (mirrors the kernel's bf16-operand / f32-accumulation math)
# and deterministic parameter init.
# ----------------------------------------------------------------------------
def reference_forward(feats, feat_lens, caps, cap_lens, params,
                      compute_dtype=jnp.bfloat16):
    del cap_lens
    audio_embeds, h0 = _encode(feats, feat_lens, params)
    N, T = caps.shape
    H = h0.shape[1]
    word_emb = jnp.take(params["emb"], caps, axis=0)
    e_all = jnp.concatenate([audio_embeds[:, None, :], word_emb[:, :T - 1, :]], axis=1)
    W_ih, W_hh, b_i, b_h, W_out, b_out = _fuse_decoder_params(params, compute_dtype)

    def step(h, e_t):
        gi = jnp.dot(e_t.astype(compute_dtype), W_ih,
                     preferred_element_type=jnp.float32) + b_i
        gh = jnp.dot(h.astype(compute_dtype), W_hh,
                     preferred_element_type=jnp.float32) + b_h
        r = jax.nn.sigmoid(gi[:, :H] + gh[:, :H])
        z = jax.nn.sigmoid(gi[:, H:2 * H] + gh[:, H:2 * H])
        n = jnp.tanh(gi[:, 2 * H:] + r * gh[:, 2 * H:])
        h_new = (1.0 - z) * n + z * h
        return h_new, h_new

    _, h_all = lax.scan(step, h0, jnp.transpose(e_all, (1, 0, 2)))     # (T, N, H)
    logits = jnp.einsum("tnh,hv->tnv", h_all.astype(compute_dtype), W_out,
                        preferred_element_type=jnp.float32) + b_out
    logits = jnp.transpose(logits, (1, 0, 2))                          # (N, T, V)
    logprobs = jax.nn.log_softmax(logits, axis=-1)
    return {
        "seqs": jnp.argmax(logits, axis=-1).astype(jnp.int32),
        "logits": logits,
        "sampled_logprobs": jnp.max(logprobs, axis=-1),
    }


def init_params(key, F, E, H, V):
    ks = jax.random.split(key, 10)
    u = lambda k, shape, bound: jax.random.uniform(k, shape, jnp.float32, -bound, bound)
    return {
        # nn.Embedding(vocab, embed) with kaiming_uniform_
        "emb": u(ks[0], (V, E), (6.0 / E) ** 0.5),
        # synthetic encoder: masked mean-pool -> linear embed / linear+tanh hidden
        "W_enc": u(ks[1], (F, E), 1.0 / F ** 0.5),
        "b_enc": u(ks[2], (E,), 1.0 / F ** 0.5),
        "W_h0": u(ks[3], (F, H), 1.0 / F ** 0.5),
        "b_h0": u(ks[4], (H,), 1.0 / F ** 0.5),
        # single-layer GRU decoder (gate order r, z, n) + vocab projection
        "W_ih": u(ks[5], (3, E, H), 1.0 / H ** 0.5),
        "W_hh": u(ks[6], (3, H, H), 1.0 / H ** 0.5),
        "b_ih": u(ks[7], (3, 1, H), 1.0 / H ** 0.5),
        "b_hh": u(ks[8], (3, 1, H), 1.0 / H ** 0.5),
        "W_out": u(ks[9], (H, V), 1.0 / H ** 0.5),
        "b_out": jnp.zeros((1, V), jnp.float32),
    }


if __name__ == "__main__":
    # Small but TPU-friendly shapes: N multiple of 8 (sublanes), E/H/3H/V multiples of 128.
    N, Tf, F = 8, 16, 48          # batch, feature frames, feature dim
    E, H, V, T = 128, 128, 256, 8  # embed, hidden, vocab, caption length

    key = jax.random.PRNGKey(0)
    k_feat, k_caps, k_par = jax.random.split(key, 3)

    feats = jax.random.normal(k_feat, (N, Tf, F), jnp.float32)
    feat_lens = jnp.full((N,), Tf, jnp.int32)
    caps = jax.random.randint(k_caps, (N, T), 0, V, jnp.int32)
    cap_lens = jnp.full((N,), T, jnp.int32)
    params = init_params(k_par, F, E, H, V)

    fwd = jax.jit(caption_model_forward)
    out = jax.block_until_ready(fwd(feats, feat_lens, caps, cap_lens, params))

    assert out["seqs"].shape == (N, T)
    assert out["logits"].shape == (N, T, V)
    assert out["sampled_logprobs"].shape == (N, T)

    # (a) greedy bookkeeping is self-consistent with the emitted logits
    logprobs = jax.nn.log_softmax(out["logits"], axis=-1)
    assert bool(jnp.all(out["seqs"] ==
                        jnp.argmax(out["logits"], axis=-1).astype(jnp.int32))), \
        "seqs != argmax(logits)"
    assert jnp.allclose(out["sampled_logprobs"], jnp.max(logprobs, axis=-1),
                        rtol=1e-4, atol=1e-4), "sampled_logprobs != max log_softmax"

    # (b) logits / logprobs match a pure-JAX reference with the same matmul precision
    ref = jax.block_until_ready(
        jax.jit(reference_forward)(feats, feat_lens, caps, cap_lens, params))
    assert jnp.allclose(out["logits"], ref["logits"], rtol=5e-3, atol=5e-3), \
        "pallas logits mismatch vs pure-JAX reference"
    assert jnp.allclose(out["sampled_logprobs"], ref["sampled_logprobs"],
                        rtol=5e-3, atol=5e-3), "sampled_logprobs mismatch vs reference"
    # greedy ids must agree except at genuine numerical near-ties
    top2 = jax.lax.top_k(ref["logits"], 2)[0]
    gap = top2[..., 0] - top2[..., 1]
    assert bool(jnp.all((out["seqs"] == ref["seqs"]) | (gap < 5e-3))), \
        "seqs mismatch vs reference (beyond numerical ties)"

    print("KERNEL_OK")
</pallas_src>

<mosaic_0001>
module attributes {stable_mosaic.version = 11 : i64} {
  func.func @_caption_decode_kernel(%arg0: i32, %arg1: memref<8x8x128xf32, #tpu.memory_space<vmem>>, %arg2: memref<8x128xf32, #tpu.memory_space<vmem>>, %arg3: memref<128x384xbf16, #tpu.memory_space<vmem>>, %arg4: memref<128x384xbf16, #tpu.memory_space<vmem>>, %arg5: memref<1x384xf32, #tpu.memory_space<vmem>>, %arg6: memref<1x384xf32, #tpu.memory_space<vmem>>, %arg7: memref<128x256xbf16, #tpu.memory_space<vmem>>, %arg8: memref<1x256xf32, #tpu.memory_space<vmem>>, %arg9: memref<64x256xf32, #tpu.memory_space<vmem>>, %arg10: memref<64x1xi32, #tpu.memory_space<vmem>>, %arg11: memref<64x1xf32, #tpu.memory_space<vmem>>, %arg12: memref<8x128xf32, #tpu.memory_space<vmem>>, %arg13: memref<8x8x384xf32, #tpu.memory_space<vmem>>, %arg14: memref<8x8x128xf32, #tpu.memory_space<vmem>>) attributes {dimension_semantics = [#tpu.dimension_semantics<arbitrary>], iteration_bounds = array<i64: 1>, scalar_prefetch = 0 : i64, scratch_operands = 3 : i64, tpu.core_type = #tpu.core_type<tc>, window_params = [{pipeline_mode = #tpu.pipeline_mode<synchronous>, transform_indices = @transform_0, window_bounds = array<i64: 8, 8, 128>}, {pipeline_mode = #tpu.pipeline_mode<synchronous>, transform_indices = @transform_1, window_bounds = array<i64: 8, 128>}, {pipeline_mode = #tpu.pipeline_mode<synchronous>, transform_indices = @transform_2, window_bounds = array<i64: 128, 384>}, {pipeline_mode = #tpu.pipeline_mode<synchronous>, transform_indices = @transform_3, window_bounds = array<i64: 128, 384>}, {pipeline_mode = #tpu.pipeline_mode<synchronous>, transform_indices = @transform_4, window_bounds = array<i64: 1, 384>}, {pipeline_mode = #tpu.pipeline_mode<synchronous>, transform_indices = @transform_5, window_bounds = array<i64: 1, 384>}, {pipeline_mode = #tpu.pipeline_mode<synchronous>, transform_indices = @transform_6, window_bounds = array<i64: 128, 256>}, {pipeline_mode = #tpu.pipeline_mode<synchronous>, transform_indices = @transform_7, window_bounds = array<i64: 1, 256>}, {pipeline_mode = #tpu.pipeline_mode<synchronous>, transform_indices = @transform_8, window_bounds = array<i64: 64, 256>}, {pipeline_mode = #tpu.pipeline_mode<synchronous>, transform_indices = @transform_9, window_bounds = array<i64: 64, 1>}, {pipeline_mode = #tpu.pipeline_mode<synchronous>, transform_indices = @transform_10, window_bounds = array<i64: 64, 1>}]} {
    %c0 = arith.constant 0 : index
    %c0_0 = arith.constant 0 : index
    %c0_1 = arith.constant 0 : index
    %0 = vector.load %arg1[%c0, %c0_0, %c0_1] : memref<8x8x128xf32, #tpu.memory_space<vmem>>, vector<8x8x128xf32>
    %1 = vector.shape_cast %0 : vector<8x8x128xf32> to vector<64x128xf32>
    %2 = arith.truncf %1 : vector<64x128xf32> to vector<64x128xbf16>
    %c0_2 = arith.constant 0 : index
    %c0_3 = arith.constant 0 : index
    %3 = vector.load %arg3[%c0_2, %c0_3] : memref<128x384xbf16, #tpu.memory_space<vmem>>, vector<128x384xbf16>
    %cst = arith.constant dense<0.000000e+00> : vector<64x384xf32>
    %4 = tpu.matmul %2, %3, %cst {dimension_numbers = #tpu.dot_dimension_numbers<[1], [0], [0], [1], [0, 0, 1, 1], [], []>} : vector<64x128xbf16>, vector<128x384xbf16>, vector<64x384xf32> -> vector<64x384xf32>
    %c0_4 = arith.constant 0 : index
    %c0_5 = arith.constant 0 : index
    %5 = vector.load %arg5[%c0_4, %c0_5] : memref<1x384xf32, #tpu.memory_space<vmem>>, vector<1x384xf32>
    %6 = vector.broadcast %5 : vector<1x384xf32> to vector<64x384xf32>
    %7 = arith.addf %4, %6 : vector<64x384xf32>
    %8 = vector.shape_cast %7 : vector<64x384xf32> to vector<8x8x384xf32>
    %c0_6 = arith.constant 0 : index
    %c0_7 = arith.constant 0 : index
    %c0_8 = arith.constant 0 : index
    %9 = vector.load %arg13[%c0_6, %c0_7, %c0_8] : memref<8x8x384xf32, #tpu.memory_space<vmem>>, vector<8x8x384xf32>
    tpu.vector_store %arg13[%c0_6, %c0_7, %c0_8], %8 {strides = array<i32>} : memref<8x8x384xf32, #tpu.memory_space<vmem>>, vector<8x8x384xf32>,
    %c0_9 = arith.constant 0 : index
    %c0_10 = arith.constant 0 : index
    %10 = vector.load %arg6[%c0_9, %c0_10] : memref<1x384xf32, #tpu.memory_space<vmem>>, vector<1x384xf32>
    %11 = vector.shape_cast %10 : vector<1x384xf32> to vector<1x384xf32>
    %12 = vector.broadcast %11 : vector<1x384xf32> to vector<8x384xf32>
    %c0_11 = arith.constant 0 : index
    %c0_12 = arith.constant 0 : index
    %13 = vector.load %arg2[%c0_11, %c0_12] : memref<8x128xf32, #tpu.memory_space<vmem>>, vector<8x128xf32>
    %c0_13 = arith.constant 0 : index
    %c0_14 = arith.constant 0 : index
    %14 = vector.load %arg12[%c0_13, %c0_14] : memref<8x128xf32, #tpu.memory_space<vmem>>, vector<8x128xf32>
    tpu.vector_store %arg12[%c0_13, %c0_14], %13 {strides = array<i32>} : memref<8x128xf32, #tpu.memory_space<vmem>>, vector<8x128xf32>,
    %c0_i32 = arith.constant 0 : i32
    %c0_15 = arith.constant 0 : index
    %c0_16 = arith.constant 0 : index
    %15 = vector.load %arg12[%c0_15, %c0_16] : memref<8x128xf32, #tpu.memory_space<vmem>>, vector<8x128xf32>
    %16 = arith.truncf %15 : vector<8x128xf32> to vector<8x128xbf16>
    %c0_17 = arith.constant 0 : index
    %c0_18 = arith.constant 0 : index
    %17 = vector.load %arg4[%c0_17, %c0_18] : memref<128x384xbf16, #tpu.memory_space<vmem>>, vector<128x384xbf16>
    %cst_19 = arith.constant dense<0.000000e+00> : vector<8x384xf32>
    %18 = tpu.matmul %16, %17, %cst_19 {dimension_numbers = #tpu.dot_dimension_numbers<[1], [0], [0], [1], [0, 0, 1, 1], [], []>} : vector<8x128xbf16>, vector<128x384xbf16>, vector<8x384xf32> -> vector<8x384xf32>
    %19 = arith.addf %18, %12 : vector<8x384xf32>
    %20 = arith.index_cast %c0_i32 : i32 to index
    %c0_20 = arith.constant 0 : index
    %c0_21 = arith.constant 0 : index
    %21 = vector.load %arg13[%20, %c0_20, %c0_21] : memref<8x8x384xf32, #tpu.memory_space<vmem>>, vector<1x8x384xf32>
    %22 = vector.shape_cast %21 : vector<1x8x384xf32> to vector<8x384xf32>
    %23 = vector.extract_strided_slice %22 {offsets = [0, 0], sizes = [8, 128], strides = [1, 1]} : vector<8x384xf32> to vector<8x128xf32>
    %24 = vector.extract_strided_slice %19 {offsets = [0, 0], sizes = [8, 128], strides = [1, 1]} : vector<8x384xf32> to vector<8x128xf32>
    %25 = arith.addf %23, %24 : vector<8x128xf32>
    %26 = arith.negf %25 : vector<8x128xf32>
    %27 = math.exp %26 : vector<8x128xf32>
    %cst_22 = arith.constant 1.000000e+00 : f32
    %28 = vector.broadcast %cst_22 : f32 to vector<8x128xf32>
    %29 = arith.addf %28, %27 : vector<8x128xf32>
    %30 = arith.divf %28, %29 : vector<8x128xf32>
    %31 = vector.extract_strided_slice %22 {offsets = [0, 128], sizes = [8, 128], strides = [1, 1]} : vector<8x384xf32> to vector<8x128xf32>
    %32 = vector.extract_strided_slice %19 {offsets = [0, 128], sizes = [8, 128], strides = [1, 1]} : vector<8x384xf32> to vector<8x128xf32>
    %33 = arith.addf %31, %32 : vector<8x128xf32>
    %34 = arith.negf %33 : vector<8x128xf32>
    %35 = math.exp %34 : vector<8x128xf32>
    %cst_23 = arith.constant 1.000000e+00 : f32
    %36 = vector.broadcast %cst_23 : f32 to vector<8x128xf32>
    %37 = arith.addf %36, %35 : vector<8x128xf32>
    %38 = arith.divf %36, %37 : vector<8x128xf32>
    %39 = vector.extract_strided_slice %22 {offsets = [0, 256], sizes = [8, 128], strides = [1, 1]} : vector<8x384xf32> to vector<8x128xf32>
    %40 = vector.extract_strided_slice %19 {offsets = [0, 256], sizes = [8, 128], strides = [1, 1]} : vector<8x384xf32> to vector<8x128xf32>
    %41 = arith.mulf %30, %40 : vector<8x128xf32>
    %42 = arith.addf %39, %41 : vector<8x128xf32>
    %43 = math.tanh %42 : vector<8x128xf32>
    %cst_24 = arith.constant 1.000000e+00 : f32
    %44 = vector.broadcast %cst_24 : f32 to vector<8x128xf32>
    %45 = arith.subf %44, %38 : vector<8x128xf32>
    %46 = arith.mulf %45, %43 : vector<8x128xf32>
    %47 = arith.mulf %38, %15 : vector<8x128xf32>
    %48 = arith.addf %46, %47 : vector<8x128xf32>
    %c0_25 = arith.constant 0 : index
    %c0_26 = arith.constant 0 : index
    %49 = vector.load %arg12[%c0_25, %c0_26] : memref<8x128xf32, #tpu.memory_space<vmem>>, vector<8x128xf32>
    tpu.vector_store %arg12[%c0_25, %c0_26], %48 {strides = array<i32>} : memref<8x128xf32, #tpu.memory_space<vmem>>, vector<8x128xf32>,
    %50 = arith.index_cast %c0_i32 : i32 to index
    %c0_27 = arith.constant 0 : index
    %c0_28 = arith.constant 0 : index
    %51 = vector.load %arg14[%50, %c0_27, %c0_28] : memref<8x8x128xf32, #tpu.memory_space<vmem>>, vector<1x8x128xf32>
    %52 = vector.shape_cast %51 : vector<1x8x128xf32> to vector<8x128xf32>
    %53 = vector.shape_cast %48 : vector<8x128xf32> to vector<1x8x128xf32>
    tpu.vector_store %arg14[%50, %c0_27, %c0_28], %53 {strides = array<i32>} : memref<8x8x128xf32, #tpu.memory_space<vmem>>, vector<1x8x128xf32>,
    %c1_i32 = arith.constant 1 : i32
    %c0_29 = arith.constant 0 : index
    %c0_30 = arith.constant 0 : index
    %54 = vector.load %arg12[%c0_29, %c0_30] : memref<8x128xf32, #tpu.memory_space<vmem>>, vector<8x128xf32>
    %55 = arith.truncf %54 : vector<8x128xf32> to vector<8x128xbf16>
    %c0_31 = arith.constant 0 : index
    %c0_32 = arith.constant 0 : index
    %56 = vector.load %arg4[%c0_31, %c0_32] : memref<128x384xbf16, #tpu.memory_space<vmem>>, vector<128x384xbf16>
    %cst_33 = arith.constant dense<0.000000e+00> : vector<8x384xf32>
    %57 = tpu.matmul %55, %56, %cst_33 {dimension_numbers = #tpu.dot_dimension_numbers<[1], [0], [0], [1], [0, 0, 1, 1], [], []>} : vector<8x128xbf16>, vector<128x384xbf16>, vector<8x384xf32> -> vector<8x384xf32>
    %58 = arith.addf %57, %12 : vector<8x384xf32>
    %59 = arith.index_cast %c1_i32 : i32 to index
    %c0_34 = arith.constant 0 : index
    %c0_35 = arith.constant 0 : index
    %60 = vector.load %arg13[%59, %c0_34, %c0_35] : memref<8x8x384xf32, #tpu.memory_space<vmem>>, vector<1x8x384xf32>
    %61 = vector.shape_cast %60 : vector<1x8x384xf32> to vector<8x384xf32>
    %62 = vector.extract_strided_slice %61 {offsets = [0, 0], sizes = [8, 128], strides = [1, 1]} : vector<8x384xf32> to vector<8x128xf32>
    %63 = vector.extract_strided_slice %58 {offsets = [0, 0], sizes = [8, 128], strides = [1, 1]} : vector<8x384xf32> to vector<8x128xf32>
    %64 = arith.addf %62, %63 : vector<8x128xf32>
    %65 = arith.negf %64 : vector<8x128xf32>
    %66 = math.exp %65 : vector<8x128xf32>
    %cst_36 = arith.constant 1.000000e+00 : f32
    %67 = vector.broadcast %cst_36 : f32 to vector<8x128xf32>
    %68 = arith.addf %67, %66 : vector<8x128xf32>
    %69 = arith.divf %67, %68 : vector<8x128xf32>
    %70 = vector.extract_strided_slice %61 {offsets = [0, 128], sizes = [8, 128], strides = [1, 1]} : vector<8x384xf32> to vector<8x128xf32>
    %71 = vector.extract_strided_slice %58 {offsets = [0, 128], sizes = [8, 128], strides = [1, 1]} : vector<8x384xf32> to vector<8x128xf32>
    %72 = arith.addf %70, %71 : vector<8x128xf32>
    %73 = arith.negf %72 : vector<8x128xf32>
    %74 = math.exp %73 : vector<8x128xf32>
    %cst_37 = arith.constant 1.000000e+00 : f32
    %75 = vector.broadcast %cst_37 : f32 to vector<8x128xf32>
    %76 = arith.addf %75, %74 : vector<8x128xf32>
    %77 = arith.divf %75, %76 : vector<8x128xf32>
    %78 = vector.extract_strided_slice %61 {offsets = [0, 256], sizes = [8, 128], strides = [1, 1]} : vector<8x384xf32> to vector<8x128xf32>
    %79 = vector.extract_strided_slice %58 {offsets = [0, 256], sizes = [8, 128], strides = [1, 1]} : vector<8x384xf32> to vector<8x128xf32>
    %80 = arith.mulf %69, %79 : vector<8x128xf32>
    %81 = arith.addf %78, %80 : vector<8x128xf32>
    %82 = math.tanh %81 : vector<8x128xf32>
    %cst_38 = arith.constant 1.000000e+00 : f32
    %83 = vector.broadcast %cst_38 : f32 to vector<8x128xf32>
    %84 = arith.subf %83, %77 : vector<8x128xf32>
    %85 = arith.mulf %84, %82 : vector<8x128xf32>
    %86 = arith.mulf %77, %54 : vector<8x128xf32>
    %87 = arith.addf %85, %86 : vector<8x128xf32>
    %c0_39 = arith.constant 0 : index
    %c0_40 = arith.constant 0 : index
    %88 = vector.load %arg12[%c0_39, %c0_40] : memref<8x128xf32, #tpu.memory_space<vmem>>, vector<8x128xf32>
    tpu.vector_store %arg12[%c0_39, %c0_40], %87 {strides = array<i32>} : memref<8x128xf32, #tpu.memory_space<vmem>>, vector<8x128xf32>,
    %89 = arith.index_cast %c1_i32 : i32 to index
    %c0_41 = arith.constant 0 : index
    %c0_42 = arith.constant 0 : index
    %90 = vector.load %arg14[%89, %c0_41, %c0_42] : memref<8x8x128xf32, #tpu.memory_space<vmem>>, vector<1x8x128xf32>
    %91 = vector.shape_cast %90 : vector<1x8x128xf32> to vector<8x128xf32>
    %92 = vector.shape_cast %87 : vector<8x128xf32> to vector<1x8x128xf32>
    tpu.vector_store %arg14[%89, %c0_41, %c0_42], %92 {strides = array<i32>} : memref<8x8x128xf32, #tpu.memory_space<vmem>>, vector<1x8x128xf32>,
    %c2_i32 = arith.constant 2 : i32
    %c0_43 = arith.constant 0 : index
    %c0_44 = arith.constant 0 : index
    %93 = vector.load %arg12[%c0_43, %c0_44] : memref<8x128xf32, #tpu.memory_space<vmem>>, vector<8x128xf32>
    %94 = arith.truncf %93 : vector<8x128xf32> to vector<8x128xbf16>
    %c0_45 = arith.constant 0 : index
    %c0_46 = arith.constant 0 : index
    %95 = vector.load %arg4[%c0_45, %c0_46] : memref<128x384xbf16, #tpu.memory_space<vmem>>, vector<128x384xbf16>
    %cst_47 = arith.constant dense<0.000000e+00> : vector<8x384xf32>
    %96 = tpu.matmul %94, %95, %cst_47 {dimension_numbers = #tpu.dot_dimension_numbers<[1], [0], [0], [1], [0, 0, 1, 1], [], []>} : vector<8x128xbf16>, vector<128x384xbf16>, vector<8x384xf32> -> vector<8x384xf32>
    %97 = arith.addf %96, %12 : vector<8x384xf32>
    %98 = arith.index_cast %c2_i32 : i32 to index
    %c0_48 = arith.constant 0 : index
    %c0_49 = arith.constant 0 : index
    %99 = vector.load %arg13[%98, %c0_48, %c0_49] : memref<8x8x384xf32, #tpu.memory_space<vmem>>, vector<1x8x384xf32>
    %100 = vector.shape_cast %99 : vector<1x8x384xf32> to vector<8x384xf32>
    %101 = vector.extract_strided_slice %100 {offsets = [0, 0], sizes = [8, 128], strides = [1, 1]} : vector<8x384xf32> to vector<8x128xf32>
    %102 = vector.extract_strided_slice %97 {offsets = [0, 0], sizes = [8, 128], strides = [1, 1]} : vector<8x384xf32> to vector<8x128xf32>
    %103 = arith.addf %101, %102 : vector<8x128xf32>
    %104 = arith.negf %103 : vector<8x128xf32>
    %105 = math.exp %104 : vector<8x128xf32>
    %cst_50 = arith.constant 1.000000e+00 : f32
    %106 = vector.broadcast %cst_50 : f32 to vector<8x128xf32>
    %107 = arith.addf %106, %105 : vector<8x128xf32>
    %108 = arith.divf %106, %107 : vector<8x128xf32>
    %109 = vector.extract_strided_slice %100 {offsets = [0, 128], sizes = [8, 128], strides = [1, 1]} : vector<8x384xf32> to vector<8x128xf32>
    %110 = vector.extract_strided_slice %97 {offsets = [0, 128], sizes = [8, 128], strides = [1, 1]} : vector<8x384xf32> to vector<8x128xf32>
    %111 = arith.addf %109, %110 : vector<8x128xf32>
    %112 = arith.negf %111 : vector<8x128xf32>
    %113 = math.exp %112 : vector<8x128xf32>
    %cst_51 = arith.constant 1.000000e+00 : f32
    %114 = vector.broadcast %cst_51 : f32 to vector<8x128xf32>
    %115 = arith.addf %114, %113 : vector<8x128xf32>
    %116 = arith.divf %114, %115 : vector<8x128xf32>
    %117 = vector.extract_strided_slice %100 {offsets = [0, 256], sizes = [8, 128], strides = [1, 1]} : vector<8x384xf32> to vector<8x128xf32>
    %118 = vector.extract_strided_slice %97 {offsets = [0, 256], sizes = [8, 128], strides = [1, 1]} : vector<8x384xf32> to vector<8x128xf32>
    %119 = arith.mulf %108, %118 : vector<8x128xf32>
    %120 = arith.addf %117, %119 : vector<8x128xf32>
    %121 = math.tanh %120 : vector<8x128xf32>
    %cst_52 = arith.constant 1.000000e+00 : f32
    %122 = vector.broadcast %cst_52 : f32 to vector<8x128xf32>
    %123 = arith.subf %122, %116 : vector<8x128xf32>
    %124 = arith.mulf %123, %121 : vector<8x128xf32>
    %125 = arith.mulf %116, %93 : vector<8x128xf32>
    %126 = arith.addf %124, %125 : vector<8x128xf32>
    %c0_53 = arith.constant 0 : index
    %c0_54 = arith.constant 0 : index
    %127 = vector.load %arg12[%c0_53, %c0_54] : memref<8x128xf32, #tpu.memory_space<vmem>>, vector<8x128xf32>
    tpu.vector_store %arg12[%c0_53, %c0_54], %126 {strides = array<i32>} : memref<8x128xf32, #tpu.memory_space<vmem>>, vector<8x128xf32>,
    %128 = arith.index_cast %c2_i32 : i32 to index
    %c0_55 = arith.constant 0 : index
    %c0_56 = arith.constant 0 : index
    %129 = vector.load %arg14[%128, %c0_55, %c0_56] : memref<8x8x128xf32, #tpu.memory_space<vmem>>, vector<1x8x128xf32>
    %130 = vector.shape_cast %129 : vector<1x8x128xf32> to vector<8x128xf32>
    %131 = vector.shape_cast %126 : vector<8x128xf32> to vector<1x8x128xf32>
    tpu.vector_store %arg14[%128, %c0_55, %c0_56], %131 {strides = array<i32>} : memref<8x8x128xf32, #tpu.memory_space<vmem>>, vector<1x8x128xf32>,
    %c3_i32 = arith.constant 3 : i32
    %c0_57 = arith.constant 0 : index
    %c0_58 = arith.constant 0 : index
    %132 = vector.load %arg12[%c0_57, %c0_58] : memref<8x128xf32, #tpu.memory_space<vmem>>, vector<8x128xf32>
    %133 = arith.truncf %132 : vector<8x128xf32> to vector<8x128xbf16>
    %c0_59 = arith.constant 0 : index
    %c0_60 = arith.constant 0 : index
    %134 = vector.load %arg4[%c0_59, %c0_60] : memref<128x384xbf16, #tpu.memory_space<vmem>>, vector<128x384xbf16>
    %cst_61 = arith.constant dense<0.000000e+00> : vector<8x384xf32>
    %135 = tpu.matmul %133, %134, %cst_61 {dimension_numbers = #tpu.dot_dimension_numbers<[1], [0], [0], [1], [0, 0, 1, 1], [], []>} : vector<8x128xbf16>, vector<128x384xbf16>, vector<8x384xf32> -> vector<8x384xf32>
    %136 = arith.addf %135, %12 : vector<8x384xf32>
    %137 = arith.index_cast %c3_i32 : i32 to index
    %c0_62 = arith.constant 0 : index
    %c0_63 = arith.constant 0 : index
    %138 = vector.load %arg13[%137, %c0_62, %c0_63] : memref<8x8x384xf32, #tpu.memory_space<vmem>>, vector<1x8x384xf32>
    %139 = vector.shape_cast %138 : vector<1x8x384xf32> to vector<8x384xf32>
    %140 = vector.extract_strided_slice %139 {offsets = [0, 0], sizes = [8, 128], strides = [1, 1]} : vector<8x384xf32> to vector<8x128xf32>
    %141 = vector.extract_strided_slice %136 {offsets = [0, 0], sizes = [8, 128], strides = [1, 1]} : vector<8x384xf32> to vector<8x128xf32>
    %142 = arith.addf %140, %141 : vector<8x128xf32>
    %143 = arith.negf %142 : vector<8x128xf32>
    %144 = math.exp %143 : vector<8x128xf32>
    %cst_64 = arith.constant 1.000000e+00 : f32
    %145 = vector.broadcast %cst_64 : f32 to vector<8x128xf32>
    %146 = arith.addf %145, %144 : vector<8x128xf32>
    %147 = arith.divf %145, %146 : vector<8x128xf32>
    %148 = vector.extract_strided_slice %139 {offsets = [0, 128], sizes = [8, 128], strides = [1, 1]} : vector<8x384xf32> to vector<8x128xf32>
    %149 = vector.extract_strided_slice %136 {offsets = [0, 128], sizes = [8, 128], strides = [1, 1]} : vector<8x384xf32> to vector<8x128xf32>
    %150 = arith.addf %148, %149 : vector<8x128xf32>
    %151 = arith.negf %150 : vector<8x128xf32>
    %152 = math.exp %151 : vector<8x128xf32>
    %cst_65 = arith.constant 1.000000e+00 : f32
    %153 = vector.broadcast %cst_65 : f32 to vector<8x128xf32>
    %154 = arith.addf %153, %152 : vector<8x128xf32>
    %155 = arith.divf %153, %154 : vector<8x128xf32>
    %156 = vector.extract_strided_slice %139 {offsets = [0, 256], sizes = [8, 128], strides = [1, 1]} : vector<8x384xf32> to vector<8x128xf32>
    %157 = vector.extract_strided_slice %136 {offsets = [0, 256], sizes = [8, 128], strides = [1, 1]} : vector<8x384xf32> to vector<8x128xf32>
    %158 = arith.mulf %147, %157 : vector<8x128xf32>
    %159 = arith.addf %156, %158 : vector<8x128xf32>
    %160 = math.tanh %159 : vector<8x128xf32>
    %cst_66 = arith.constant 1.000000e+00 : f32
    %161 = vector.broadcast %cst_66 : f32 to vector<8x128xf32>
    %162 = arith.subf %161, %155 : vector<8x128xf32>
    %163 = arith.mulf %162, %160 : vector<8x128xf32>
    %164 = arith.mulf %155, %132 : vector<8x128xf32>
    %165 = arith.addf %163, %164 : vector<8x128xf32>
    %c0_67 = arith.constant 0 : index
    %c0_68 = arith.constant 0 : index
    %166 = vector.load %arg12[%c0_67, %c0_68] : memref<8x128xf32, #tpu.memory_space<vmem>>, vector<8x128xf32>
    tpu.vector_store %arg12[%c0_67, %c0_68], %165 {strides = array<i32>} : memref<8x128xf32, #tpu.memory_space<vmem>>, vector<8x128xf32>,
    %167 = arith.index_cast %c3_i32 : i32 to index
    %c0_69 = arith.constant 0 : index
    %c0_70 = arith.constant 0 : index
    %168 = vector.load %arg14[%167, %c0_69, %c0_70] : memref<8x8x128xf32, #tpu.memory_space<vmem>>, vector<1x8x128xf32>
    %169 = vector.shape_cast %168 : vector<1x8x128xf32> to vector<8x128xf32>
    %170 = vector.shape_cast %165 : vector<8x128xf32> to vector<1x8x128xf32>
    tpu.vector_store %arg14[%167, %c0_69, %c0_70], %170 {strides = array<i32>} : memref<8x8x128xf32, #tpu.memory_space<vmem>>, vector<1x8x128xf32>,
    %c4_i32 = arith.constant 4 : i32
    %c0_71 = arith.constant 0 : index
    %c0_72 = arith.constant 0 : index
    %171 = vector.load %arg12[%c0_71, %c0_72] : memref<8x128xf32, #tpu.memory_space<vmem>>, vector<8x128xf32>
    %172 = arith.truncf %171 : vector<8x128xf32> to vector<8x128xbf16>
    %c0_73 = arith.constant 0 : index
    %c0_74 = arith.constant 0 : index
    %173 = vector.load %arg4[%c0_73, %c0_74] : memref<128x384xbf16, #tpu.memory_space<vmem>>, vector<128x384xbf16>
    %cst_75 = arith.constant dense<0.000000e+00> : vector<8x384xf32>
    %174 = tpu.matmul %172, %173, %cst_75 {dimension_numbers = #tpu.dot_dimension_numbers<[1], [0], [0], [1], [0, 0, 1, 1], [], []>} : vector<8x128xbf16>, vector<128x384xbf16>, vector<8x384xf32> -> vector<8x384xf32>
    %175 = arith.addf %174, %12 : vector<8x384xf32>
    %176 = arith.index_cast %c4_i32 : i32 to index
    %c0_76 = arith.constant 0 : index
    %c0_77 = arith.constant 0 : index
    %177 = vector.load %arg13[%176, %c0_76, %c0_77] : memref<8x8x384xf32, #tpu.memory_space<vmem>>, vector<1x8x384xf32>
    %178 = vector.shape_cast %177 : vector<1x8x384xf32> to vector<8x384xf32>
    %179 = vector.extract_strided_slice %178 {offsets = [0, 0], sizes = [8, 128], strides = [1, 1]} : vector<8x384xf32> to vector<8x128xf32>
    %180 = vector.extract_strided_slice %175 {offsets = [0, 0], sizes = [8, 128], strides = [1, 1]} : vector<8x384xf32> to vector<8x128xf32>
    %181 = arith.addf %179, %180 : vector<8x128xf32>
    %182 = arith.negf %181 : vector<8x128xf32>
    %183 = math.exp %182 : vector<8x128xf32>
    %cst_78 = arith.constant 1.000000e+00 : f32
    %184 = vector.broadcast %cst_78 : f32 to vector<8x128xf32>
    %185 = arith.addf %184, %183 : vector<8x128xf32>
    %186 = arith.divf %184, %185 : vector<8x128xf32>
    %187 = vector.extract_strided_slice %178 {offsets = [0, 128], sizes = [8, 128], strides = [1, 1]} : vector<8x384xf32> to vector<8x128xf32>
    %188 = vector.extract_strided_slice %175 {offsets = [0, 128], sizes = [8, 128], strides = [1, 1]} : vector<8x384xf32> to vector<8x128xf32>
    %189 = arith.addf %187, %188 : vector<8x128xf32>
    %190 = arith.negf %189 : vector<8x128xf32>
    %191 = math.exp %190 : vector<8x128xf32>
    %cst_79 = arith.constant 1.000000e+00 : f32
    %192 = vector.broadcast %cst_79 : f32 to vector<8x128xf32>
    %193 = arith.addf %192, %191 : vector<8x128xf32>
    %194 = arith.divf %192, %193 : vector<8x128xf32>
    %195 = vector.extract_strided_slice %178 {offsets = [0, 256], sizes = [8, 128], strides = [1, 1]} : vector<8x384xf32> to vector<8x128xf32>
    %196 = vector.extract_strided_slice %175 {offsets = [0, 256], sizes = [8, 128], strides = [1, 1]} : vector<8x384xf32> to vector<8x128xf32>
    %197 = arith.mulf %186, %196 : vector<8x128xf32>
    %198 = arith.addf %195, %197 : vector<8x128xf32>
    %199 = math.tanh %198 : vector<8x128xf32>
    %cst_80 = arith.constant 1.000000e+00 : f32
    %200 = vector.broadcast %cst_80 : f32 to vector<8x128xf32>
    %201 = arith.subf %200, %194 : vector<8x128xf32>
    %202 = arith.mulf %201, %199 : vector<8x128xf32>
    %203 = arith.mulf %194, %171 : vector<8x128xf32>
    %204 = arith.addf %202, %203 : vector<8x128xf32>
    %c0_81 = arith.constant 0 : index
    %c0_82 = arith.constant 0 : index
    %205 = vector.load %arg12[%c0_81, %c0_82] : memref<8x128xf32, #tpu.memory_space<vmem>>, vector<8x128xf32>
    tpu.vector_store %arg12[%c0_81, %c0_82], %204 {strides = array<i32>} : memref<8x128xf32, #tpu.memory_space<vmem>>, vector<8x128xf32>,
    %206 = arith.index_cast %c4_i32 : i32 to index
    %c0_83 = arith.constant 0 : index
    %c0_84 = arith.constant 0 : index
    %207 = vector.load %arg14[%206, %c0_83, %c0_84] : memref<8x8x128xf32, #tpu.memory_space<vmem>>, vector<1x8x128xf32>
    %208 = vector.shape_cast %207 : vector<1x8x128xf32> to vector<8x128xf32>
    %209 = vector.shape_cast %204 : vector<8x128xf32> to vector<1x8x128xf32>
    tpu.vector_store %arg14[%206, %c0_83, %c0_84], %209 {strides = array<i32>} : memref<8x8x128xf32, #tpu.memory_space<vmem>>, vector<1x8x128xf32>,
    %c5_i32 = arith.constant 5 : i32
    %c0_85 = arith.constant 0 : index
    %c0_86 = arith.constant 0 : index
    %210 = vector.load %arg12[%c0_85, %c0_86] : memref<8x128xf32, #tpu.memory_space<vmem>>, vector<8x128xf32>
    %211 = arith.truncf %210 : vector<8x128xf32> to vector<8x128xbf16>
    %c0_87 = arith.constant 0 : index
    %c0_88 = arith.constant 0 : index
    %212 = vector.load %arg4[%c0_87, %c0_88] : memref<128x384xbf16, #tpu.memory_space<vmem>>, vector<128x384xbf16>
    %cst_89 = arith.constant dense<0.000000e+00> : vector<8x384xf32>
    %213 = tpu.matmul %211, %212, %cst_89 {dimension_numbers = #tpu.dot_dimension_numbers<[1], [0], [0], [1], [0, 0, 1, 1], [], []>} : vector<8x128xbf16>, vector<128x384xbf16>, vector<8x384xf32> -> vector<8x384xf32>
    %214 = arith.addf %213, %12 : vector<8x384xf32>
    %215 = arith.index_cast %c5_i32 : i32 to index
    %c0_90 = arith.constant 0 : index
    %c0_91 = arith.constant 0 : index
    %216 = vector.load %arg13[%215, %c0_90, %c0_91] : memref<8x8x384xf32, #tpu.memory_space<vmem>>, vector<1x8x384xf32>
    %217 = vector.shape_cast %216 : vector<1x8x384xf32> to vector<8x384xf32>
    %218 = vector.extract_strided_slice %217 {offsets = [0, 0], sizes = [8, 128], strides = [1, 1]} : vector<8x384xf32> to vector<8x128xf32>
    %219 = vector.extract_strided_slice %214 {offsets = [0, 0], sizes = [8, 128], strides = [1, 1]} : vector<8x384xf32> to vector<8x128xf32>
    %220 = arith.addf %218, %219 : vector<8x128xf32>
    %221 = arith.negf %220 : vector<8x128xf32>
    %222 = math.exp %221 : vector<8x128xf32>
    %cst_92 = arith.constant 1.000000e+00 : f32
    %223 = vector.broadcast %cst_92 : f32 to vector<8x128xf32>
    %224 = arith.addf %223, %222 : vector<8x128xf32>
    %225 = arith.divf %223, %224 : vector<8x128xf32>
    %226 = vector.extract_strided_slice %217 {offsets = [0, 128], sizes = [8, 128], strides = [1, 1]} : vector<8x384xf32> to vector<8x128xf32>
    %227 = vector.extract_strided_slice %214 {offsets = [0, 128], sizes = [8, 128], strides = [1, 1]} : vector<8x384xf32> to vector<8x128xf32>
    %228 = arith.addf %226, %227 : vector<8x128xf32>
    %229 = arith.negf %228 : vector<8x128xf32>
    %230 = math.exp %229 : vector<8x128xf32>
    %cst_93 = arith.constant 1.000000e+00 : f32
    %231 = vector.broadcast %cst_93 : f32 to vector<8x128xf32>
    %232 = arith.addf %231, %230 : vector<8x128xf32>
    %233 = arith.divf %231, %232 : vector<8x128xf32>
    %234 = vector.extract_strided_slice %217 {offsets = [0, 256], sizes = [8, 128], strides = [1, 1]} : vector<8x384xf32> to vector<8x128xf32>
    %235 = vector.extract_strided_slice %214 {offsets = [0, 256], sizes = [8, 128], strides = [1, 1]} : vector<8x384xf32> to vector<8x128xf32>
    %236 = arith.mulf %225, %235 : vector<8x128xf32>
    %237 = arith.addf %234, %236 : vector<8x128xf32>
    %238 = math.tanh %237 : vector<8x128xf32>
    %cst_94 = arith.constant 1.000000e+00 : f32
    %239 = vector.broadcast %cst_94 : f32 to vector<8x128xf32>
    %240 = arith.subf %239, %233 : vector<8x128xf32>
    %241 = arith.mulf %240, %238 : vector<8x128xf32>
    %242 = arith.mulf %233, %210 : vector<8x128xf32>
    %243 = arith.addf %241, %242 : vector<8x128xf32>
    %c0_95 = arith.constant 0 : index
    %c0_96 = arith.constant 0 : index
    %244 = vector.load %arg12[%c0_95, %c0_96] : memref<8x128xf32, #tpu.memory_space<vmem>>, vector<8x128xf32>
    tpu.vector_store %arg12[%c0_95, %c0_96], %243 {strides = array<i32>} : memref<8x128xf32, #tpu.memory_space<vmem>>, vector<8x128xf32>,
    %245 = arith.index_cast %c5_i32 : i32 to index
    %c0_97 = arith.constant 0 : index
    %c0_98 = arith.constant 0 : index
    %246 = vector.load %arg14[%245, %c0_97, %c0_98] : memref<8x8x128xf32, #tpu.memory_space<vmem>>, vector<1x8x128xf32>
    %247 = vector.shape_cast %246 : vector<1x8x128xf32> to vector<8x128xf32>
    %248 = vector.shape_cast %243 : vector<8x128xf32> to vector<1x8x128xf32>
    tpu.vector_store %arg14[%245, %c0_97, %c0_98], %248 {strides = array<i32>} : memref<8x8x128xf32, #tpu.memory_space<vmem>>, vector<1x8x128xf32>,
    %c6_i32 = arith.constant 6 : i32
    %c0_99 = arith.constant 0 : index
    %c0_100 = arith.constant 0 : index
    %249 = vector.load %arg12[%c0_99, %c0_100] : memref<8x128xf32, #tpu.memory_space<vmem>>, vector<8x128xf32>
    %250 = arith.truncf %249 : vector<8x128xf32> to vector<8x128xbf16>
    %c0_101 = arith.constant 0 : index
    %c0_102 = arith.constant 0 : index
    %251 = vector.load %arg4[%c0_101, %c0_102] : memref<128x384xbf16, #tpu.memory_space<vmem>>, vector<128x384xbf16>
    %cst_103 = arith.constant dense<0.000000e+00> : vector<8x384xf32>
    %252 = tpu.matmul %250, %251, %cst_103 {dimension_numbers = #tpu.dot_dimension_numbers<[1], [0], [0], [1], [0, 0, 1, 1], [], []>} : vector<8x128xbf16>, vector<128x384xbf16>, vector<8x384xf32> -> vector<8x384xf32>
    %253 = arith.addf %252, %12 : vector<8x384xf32>
    %254 = arith.index_cast %c6_i32 : i32 to index
    %c0_104 = arith.constant 0 : index
    %c0_105 = arith.constant 0 : index
    %255 = vector.load %arg13[%254, %c0_104, %c0_105] : memref<8x8x384xf32, #tpu.memory_space<vmem>>, vector<1x8x384xf32>
    %256 = vector.shape_cast %255 : vector<1x8x384xf32> to vector<8x384xf32>
    %257 = vector.extract_strided_slice %256 {offsets = [0, 0], sizes = [8, 128], strides = [1, 1]} : vector<8x384xf32> to vector<8x128xf32>
    %258 = vector.extract_strided_slice %253 {offsets = [0, 0], sizes = [8, 128], strides = [1, 1]} : vector<8x384xf32> to vector<8x128xf32>
    %259 = arith.addf %257, %258 : vector<8x128xf32>
    %260 = arith.negf %259 : vector<8x128xf32>
    %261 = math.exp %260 : vector<8x128xf32>
    %cst_106 = arith.constant 1.000000e+00 : f32
    %262 = vector.broadcast %cst_106 : f32 to vector<8x128xf32>
    %263 = arith.addf %262, %261 : vector<8x128xf32>
    %264 = arith.divf %262, %263 : vector<8x128xf32>
    %265 = vector.extract_strided_slice %256 {offsets = [0, 128], sizes = [8, 128], strides = [1, 1]} : vector<8x384xf32> to vector<8x128xf32>
    %266 = vector.extract_strided_slice %253 {offsets = [0, 128], sizes = [8, 128], strides = [1, 1]} : vector<8x384xf32> to vector<8x128xf32>
    %267 = arith.addf %265, %266 : vector<8x128xf32>
    %268 = arith.negf %267 : vector<8x128xf32>
    %269 = math.exp %268 : vector<8x128xf32>
    %cst_107 = arith.constant 1.000000e+00 : f32
    %270 = vector.broadcast %cst_107 : f32 to vector<8x128xf32>
    %271 = arith.addf %270, %269 : vector<8x128xf32>
    %272 = arith.divf %270, %271 : vector<8x128xf32>
    %273 = vector.extract_strided_slice %256 {offsets = [0, 256], sizes = [8, 128], strides = [1, 1]} : vector<8x384xf32> to vector<8x128xf32>
    %274 = vector.extract_strided_slice %253 {offsets = [0, 256], sizes = [8, 128], strides = [1, 1]} : vector<8x384xf32> to vector<8x128xf32>
    %275 = arith.mulf %264, %274 : vector<8x128xf32>
    %276 = arith.addf %273, %275 : vector<8x128xf32>
    %277 = math.tanh %276 : vector<8x128xf32>
    %cst_108 = arith.constant 1.000000e+00 : f32
    %278 = vector.broadcast %cst_108 : f32 to vector<8x128xf32>
    %279 = arith.subf %278, %272 : vector<8x128xf32>
    %280 = arith.mulf %279, %277 : vector<8x128xf32>
    %281 = arith.mulf %272, %249 : vector<8x128xf32>
    %282 = arith.addf %280, %281 : vector<8x128xf32>
    %c0_109 = arith.constant 0 : index
    %c0_110 = arith.constant 0 : index
    %283 = vector.load %arg12[%c0_109, %c0_110] : memref<8x128xf32, #tpu.memory_space<vmem>>, vector<8x128xf32>
    tpu.vector_store %arg12[%c0_109, %c0_110], %282 {strides = array<i32>} : memref<8x128xf32, #tpu.memory_space<vmem>>, vector<8x128xf32>,
    %284 = arith.index_cast %c6_i32 : i32 to index
    %c0_111 = arith.constant 0 : index
    %c0_112 = arith.constant 0 : index
    %285 = vector.load %arg14[%284, %c0_111, %c0_112] : memref<8x8x128xf32, #tpu.memory_space<vmem>>, vector<1x8x128xf32>
    %286 = vector.shape_cast %285 : vector<1x8x128xf32> to vector<8x128xf32>
    %287 = vector.shape_cast %282 : vector<8x128xf32> to vector<1x8x128xf32>
    tpu.vector_store %arg14[%284, %c0_111, %c0_112], %287 {strides = array<i32>} : memref<8x8x128xf32, #tpu.memory_space<vmem>>, vector<1x8x128xf32>,
    %c7_i32 = arith.constant 7 : i32
    %c0_113 = arith.constant 0 : index
    %c0_114 = arith.constant 0 : index
    %288 = vector.load %arg12[%c0_113, %c0_114] : memref<8x128xf32, #tpu.memory_space<vmem>>, vector<8x128xf32>
    %289 = arith.truncf %288 : vector<8x128xf32> to vector<8x128xbf16>
    %c0_115 = arith.constant 0 : index
    %c0_116 = arith.constant 0 : index
    %290 = vector.load %arg4[%c0_115, %c0_116] : memref<128x384xbf16, #tpu.memory_space<vmem>>, vector<128x384xbf16>
    %cst_117 = arith.constant dense<0.000000e+00> : vector<8x384xf32>
    %291 = tpu.matmul %289, %290, %cst_117 {dimension_numbers = #tpu.dot_dimension_numbers<[1], [0], [0], [1], [0, 0, 1, 1], [], []>} : vector<8x128xbf16>, vector<128x384xbf16>, vector<8x384xf32> -> vector<8x384xf32>
    %292 = arith.addf %291, %12 : vector<8x384xf32>
    %293 = arith.index_cast %c7_i32 : i32 to index
    %c0_118 = arith.constant 0 : index
    %c0_119 = arith.constant 0 : index
    %294 = vector.load %arg13[%293, %c0_118, %c0_119] : memref<8x8x384xf32, #tpu.memory_space<vmem>>, vector<1x8x384xf32>
    %295 = vector.shape_cast %294 : vector<1x8x384xf32> to vector<8x384xf32>
    %296 = vector.extract_strided_slice %295 {offsets = [0, 0], sizes = [8, 128], strides = [1, 1]} : vector<8x384xf32> to vector<8x128xf32>
    %297 = vector.extract_strided_slice %292 {offsets = [0, 0], sizes = [8, 128], strides = [1, 1]} : vector<8x384xf32> to vector<8x128xf32>
    %298 = arith.addf %296, %297 : vector<8x128xf32>
    %299 = arith.negf %298 : vector<8x128xf32>
    %300 = math.exp %299 : vector<8x128xf32>
    %cst_120 = arith.constant 1.000000e+00 : f32
    %301 = vector.broadcast %cst_120 : f32 to vector<8x128xf32>
    %302 = arith.addf %301, %300 : vector<8x128xf32>
    %303 = arith.divf %301, %302 : vector<8x128xf32>
    %304 = vector.extract_strided_slice %295 {offsets = [0, 128], sizes = [8, 128], strides = [1, 1]} : vector<8x384xf32> to vector<8x128xf32>
    %305 = vector.extract_strided_slice %292 {offsets = [0, 128], sizes = [8, 128], strides = [1, 1]} : vector<8x384xf32> to vector<8x128xf32>
    %306 = arith.addf %304, %305 : vector<8x128xf32>
    %307 = arith.negf %306 : vector<8x128xf32>
    %308 = math.exp %307 : vector<8x128xf32>
    %cst_121 = arith.constant 1.000000e+00 : f32
    %309 = vector.broadcast %cst_121 : f32 to vector<8x128xf32>
    %310 = arith.addf %309, %308 : vector<8x128xf32>
    %311 = arith.divf %309, %310 : vector<8x128xf32>
    %312 = vector.extract_strided_slice %295 {offsets = [0, 256], sizes = [8, 128], strides = [1, 1]} : vector<8x384xf32> to vector<8x128xf32>
    %313 = vector.extract_strided_slice %292 {offsets = [0, 256], sizes = [8, 128], strides = [1, 1]} : vector<8x384xf32> to vector<8x128xf32>
    %314 = arith.mulf %303, %313 : vector<8x128xf32>
    %315 = arith.addf %312, %314 : vector<8x128xf32>
    %316 = math.tanh %315 : vector<8x128xf32>
    %cst_122 = arith.constant 1.000000e+00 : f32
    %317 = vector.broadcast %cst_122 : f32 to vector<8x128xf32>
    %318 = arith.subf %317, %311 : vector<8x128xf32>
    %319 = arith.mulf %318, %316 : vector<8x128xf32>
    %320 = arith.mulf %311, %288 : vector<8x128xf32>
    %321 = arith.addf %319, %320 : vector<8x128xf32>
    %c0_123 = arith.constant 0 : index
    %c0_124 = arith.constant 0 : index
    %322 = vector.load %arg12[%c0_123, %c0_124] : memref<8x128xf32, #tpu.memory_space<vmem>>, vector<8x128xf32>
    tpu.vector_store %arg12[%c0_123, %c0_124], %321 {strides = array<i32>} : memref<8x128xf32, #tpu.memory_space<vmem>>, vector<8x128xf32>,
    %323 = arith.index_cast %c7_i32 : i32 to index
    %c0_125 = arith.constant 0 : index
    %c0_126 = arith.constant 0 : index
    %324 = vector.load %arg14[%323, %c0_125, %c0_126] : memref<8x8x128xf32, #tpu.memory_space<vmem>>, vector<1x8x128xf32>
    %325 = vector.shape_cast %324 : vector<1x8x128xf32> to vector<8x128xf32>
    %326 = vector.shape_cast %321 : vector<8x128xf32> to vector<1x8x128xf32>
    tpu.vector_store %arg14[%323, %c0_125, %c0_126], %326 {strides = array<i32>} : memref<8x8x128xf32, #tpu.memory_space<vmem>>, vector<1x8x128xf32>,
    %c8_i32 = arith.constant 8 : i32
    %c0_127 = arith.constant 0 : index
    %c0_128 = arith.constant 0 : index
    %c0_129 = arith.constant 0 : index
    %327 = vector.load %arg14[%c0_127, %c0_128, %c0_129] : memref<8x8x128xf32, #tpu.memory_space<vmem>>, vector<8x8x128xf32>
    %328 = vector.shape_cast %327 : vector<8x8x128xf32> to vector<64x128xf32>
    %329 = arith.truncf %328 : vector<64x128xf32> to vector<64x128xbf16>
    %c0_130 = arith.constant 0 : index
    %c0_131 = arith.constant 0 : index
    %330 = vector.load %arg7[%c0_130, %c0_131] : memref<128x256xbf16, #tpu.memory_space<vmem>>, vector<128x256xbf16>
    %cst_132 = arith.constant dense<0.000000e+00> : vector<64x256xf32>
    %331 = tpu.matmul %329, %330, %cst_132 {dimension_numbers = #tpu.dot_dimension_numbers<[1], [0], [0], [1], [0, 0, 1, 1], [], []>} : vector<64x128xbf16>, vector<128x256xbf16>, vector<64x256xf32> -> vector<64x256xf32>
    %c0_133 = arith.constant 0 : index
    %c0_134 = arith.constant 0 : index
    %332 = vector.load %arg8[%c0_133, %c0_134] : memref<1x256xf32, #tpu.memory_space<vmem>>, vector<1x256xf32>
    %333 = vector.broadcast %332 : vector<1x256xf32> to vector<64x256xf32>
    %334 = arith.addf %331, %333 : vector<64x256xf32>
    %c0_135 = arith.constant 0 : index
    %c0_136 = arith.constant 0 : index
    %335 = vector.load %arg9[%c0_135, %c0_136] : memref<64x256xf32, #tpu.memory_space<vmem>>, vector<64x256xf32>
    tpu.vector_store %arg9[%c0_135, %c0_136], %334 {strides = array<i32>} : memref<64x256xf32, #tpu.memory_space<vmem>>, vector<64x256xf32>,
    %cst_137 = arith.constant dense<0xFF800000> : vector<64xf32>
    %336 = vector.multi_reduction <maximumf>, %334, %cst_137 [1] : vector<64x256xf32> to vector<64xf32>
    %337 = vector.shape_cast %336 : vector<64xf32> to vector<64x1xf32>
    %338 = vector.broadcast %337 : vector<64x1xf32> to vector<64x256xf32>
    %339 = arith.subf %334, %338 : vector<64x256xf32>
    %340 = math.exp %339 : vector<64x256xf32>
    %cst_138 = arith.constant dense<0.000000e+00> : vector<64xf32>
    %341 = vector.multi_reduction <add>, %340, %cst_138 [1] : vector<64x256xf32> to vector<64xf32>
    %342 = vector.shape_cast %341 : vector<64xf32> to vector<64x1xf32>
    %343 = math.log %342 : vector<64x1xf32>
    %cst_139 = arith.constant 0.000000e+00 : f32
    %344 = vector.broadcast %cst_139 : f32 to vector<64x1xf32>
    %345 = arith.subf %344, %343 : vector<64x1xf32>
    %c0_140 = arith.constant 0 : index
    %c0_141 = arith.constant 0 : index
    %346 = vector.load %arg11[%c0_140, %c0_141] : memref<64x1xf32, #tpu.memory_space<vmem>>, vector<64x1xf32>
    tpu.vector_store %arg11[%c0_140, %c0_141], %345 {strides = array<i32>} : memref<64x1xf32, #tpu.memory_space<vmem>>, vector<64x1xf32>,
    %347 = tpu.iota {dimensions = array<i32: 1>} : vector<64x256xi32>
    %348 = vector.broadcast %337 : vector<64x1xf32> to vector<64x256xf32>
    %349 = arith.cmpf oge, %334, %348 : vector<64x256xf32>
    %c256_i32 = arith.constant 256 : i32
    %350 = vector.broadcast %c256_i32 : i32 to vector<64x256xi32>
    %351 = arith.select %349, %347, %350 : vector<64x256xi1>, vector<64x256xi32>
    %cst_142 = arith.constant dense<2147483647> : vector<64xi32>
    %352 = vector.multi_reduction <minsi>, %351, %cst_142 [1] : vector<64x256xi32> to vector<64xi32>
    %353 = vector.shape_cast %352 : vector<64xi32> to vector<64x1xi32>
    %c0_143 = arith.constant 0 : index
    %c0_144 = arith.constant 0 : index
    %354 = vector.load %arg10[%c0_143, %c0_144] : memref<64x1xi32, #tpu.memory_space<vmem>>, vector<64x1xi32>
    tpu.vector_store %arg10[%c0_143, %c0_144], %353 {strides = array<i32>} : memref<64x1xi32, #tpu.memory_space<vmem>>, vector<64x1xi32>,
    return
  }
  func.func @transform_0(%arg0: i32) -> (i32, i32, i32) {
    %c0_i32 = arith.constant 0 : i32
    %c0_i32_0 = arith.constant 0 : i32
    %c0_i32_1 = arith.constant 0 : i32
    %c0_i32_2 = arith.constant 0 : i32
    return %c0_i32, %c0_i32_0, %c0_i32_1 : i32, i32, i32
  }
  func.func @transform_1(%arg0: i32) -> (i32, i32) {
    %c0_i32 = arith.constant 0 : i32
    %c0_i32_0 = arith.constant 0 : i32
    %c0_i32_1 = arith.constant 0 : i32
    return %c0_i32, %c0_i32_0 : i32, i32
  }
  func.func @transform_2(%arg0: i32) -> (i32, i32) {
    %c0_i32 = arith.constant 0 : i32
    %c0_i32_0 = arith.constant 0 : i32
    %c0_i32_1 = arith.constant 0 : i32
    return %c0_i32, %c0_i32_0 : i32, i32
  }
  func.func @transform_3(%arg0: i32) -> (i32, i32) {
    %c0_i32 = arith.constant 0 : i32
    %c0_i32_0 = arith.constant 0 : i32
    %c0_i32_1 = arith.constant 0 : i32
    return %c0_i32, %c0_i32_0 : i32, i32
  }
  func.func @transform_4(%arg0: i32) -> (i32, i32) {
    %c0_i32 = arith.constant 0 : i32
    %c0_i32_0 = arith.constant 0 : i32
    %c0_i32_1 = arith.constant 0 : i32
    return %c0_i32, %c0_i32_0 : i32, i32
  }
  func.func @transform_5(%arg0: i32) -> (i32, i32) {
    %c0_i32 = arith.constant 0 : i32
    %c0_i32_0 = arith.constant 0 : i32
    %c0_i32_1 = arith.constant 0 : i32
    return %c0_i32, %c0_i32_0 : i32, i32
  }
  func.func @transform_6(%arg0: i32) -> (i32, i32) {
    %c0_i32 = arith.constant 0 : i32
    %c0_i32_0 = arith.constant 0 : i32
    %c0_i32_1 = arith.constant 0 : i32
    return %c0_i32, %c0_i32_0 : i32, i32
  }
  func.func @transform_7(%arg0: i32) -> (i32, i32) {
    %c0_i32 = arith.constant 0 : i32
    %c0_i32_0 = arith.constant 0 : i32
    %c0_i32_1 = arith.constant 0 : i32
    return %c0_i32, %c0_i32_0 : i32, i32
  }
  func.func @transform_8(%arg0: i32) -> (i32, i32) {
    %c0_i32 = arith.constant 0 : i32
    %c0_i32_0 = arith.constant 0 : i32
    %c0_i32_1 = arith.constant 0 : i32
    return %c0_i32, %c0_i32_0 : i32, i32
  }
  func.func @transform_9(%arg0: i32) -> (i32, i32) {
    %c0_i32 = arith.constant 0 : i32
    %c0_i32_0 = arith.constant 0 : i32
    %c0_i32_1 = arith.constant 0 : i32
    return %c0_i32, %c0_i32_0 : i32, i32
  }
  func.func @transform_10(%arg0: i32) -> (i32, i32) {
    %c0_i32 = arith.constant 0 : i32
    %c0_i32_0 = arith.constant 0 : i32
    %c0_i32_1 = arith.constant 0 : i32
    return %c0_i32, %c0_i32_0 : i32, i32
  }
}

</mosaic_0001>

<bundles_post_ra>
// kernel: caption_model_forward.1
= control target key start
LH: loop header
LB: loop body
LE: loop exit
PB: predicated region body
PF: predicated region fallthrough
CT: control target
= control target key end

     0   :  { %v3905_v1 = vmov 0   ;;  %v3906_v56 = vmov 0.0   ;;  %vm3907_vm0 = vmmov 0   ;;  %s5240_s2 = inlined_call_operand.vmem [shape: bf16[128,384], index: 2, kind: input, shape index: {}]   ;;  %s5241_s3 = inlined_call_operand.vmem [shape: bf16[128,384], index: 3, kind: input, shape index: {}]   ;;  %s5242_s0 = inlined_call_operand.vmem [shape: f32[8,8,128], index: 0, kind: input, shape index: {}]   ;;  %s5243_s1 = inlined_call_operand.vmem [shape: f32[8,128], index: 1, kind: input, shape index: {}]   ;;  %s5244_s4 = inlined_call_operand.vmem [shape: f32[1,384], index: 4, kind: input, shape index: {}]   ;;  %s5245_s5 = inlined_call_operand.vmem [shape: f32[1,384], index: 5, kind: input, shape index: {}]   ;;  %s5246_s6 = inlined_call_operand.vmem [shape: bf16[128,256], index: 6, kind: input, shape index: {}]   ;;  %s5247_s7 = inlined_call_operand.vmem [shape: f32[1,256], index: 7, kind: input, shape index: {}]   ;;  %s5248_s8 = inlined_call_operand.vmem [shape: f32[64,256], index: 8, kind: output, shape index: {0}]   ;;  %s5249_s10 = inlined_call_operand.vmem [shape: f32[64,1], index: 10, kind: output, shape index: {2}]   ;;  %s5250_s9 = inlined_call_operand.vmem [shape: s32[64,1], index: 9, kind: output, shape index: {1}]  }
   0x1   :  { %v3609_v0 = vld [vmem:[%s5240_s2 + $0xac] ss:$12 sps:$4 sm:$0xff]   ;;  %254 = vmatprep.mubr.bf16.mxu1 %v3905_v1  ;;  %597 = vmatprep.mubr.bf16.mxu0 %v3905_v1  ;;  %v3613_v3 = vld [vmem:[%s5240_s2 + $0xa8] ss:$12 sps:$4 sm:$0xff]   ;;  %v3619_v7 = vld [vmem:[%s5240_s2 + $0x90] ss:$12 sps:$4 sm:$0xff]  }
   0x2   :  { %v3971_v2 = vld [vmem:[%s5241_s3 + $0xac] ss:$12 sps:$4 sm:$0xff]   ;;  %222 = vmatprep.subr.bf16.mxu1 %v3609_v0  ;;  %v3979_v4 = vld [vmem:[%s5241_s3 + $0xa8] ss:$12 sps:$4 sm:$0xff]   ;;  %v3997_v8 = vld [vmem:[%s5241_s3 + $0x90] ss:$12 sps:$4 sm:$0xff]  }
   0x3   :  { %565 = vmatprep.subr.bf16.mxu0 %v3971_v2  ;;  %v3615_v5 = vld [vmem:[%s5240_s2 + $0x94] ss:$12 sps:$4 sm:$0xff]   ;;  %223 = vmatpush1.bf16.msra.mxu1 %v3613_v3  ;;  %v3621_v9 = vld [vmem:[%s5240_s2 + $0x7c] ss:$12 sps:$4 sm:$0xff]   ;;  %v3625_v11 = vld [vmem:[%s5240_s2 + $0x78] ss:$12 sps:$4 sm:$0xff]  }
   0x4   :  { %566 = vmatpush1.bf16.msra.mxu0 %v3979_v4  ;;  %v3989_v6 = vld [vmem:[%s5241_s3 + $0x94] ss:$12 sps:$4 sm:$0xff]   ;;  %224 = vmatprep.subr.bf16.mxu1 %v3615_v5  ;;  %v4006_v10 = vld [vmem:[%s5241_s3 + $0x7c] ss:$12 sps:$4 sm:$0xff]   ;;  %v4014_v12 = vld [vmem:[%s5241_s3 + $0x78] ss:$12 sps:$4 sm:$0xff]  }
   0x5   :  { %567 = vmatprep.subr.bf16.mxu0 %v3989_v6  ;;  %v3627_v13 = vld [vmem:[%s5240_s2 + $0x64] ss:$12 sps:$4 sm:$0xff]   ;;  %v3631_v15 = vld [vmem:[%s5240_s2 + $0x60] ss:$12 sps:$4 sm:$0xff]   ;;  %v3637_v19 = vld [vmem:[%s5240_s2 + $0x48] ss:$12 sps:$4 sm:$0xff]  }
   0x6   :  { %v4024_v14 = vld [vmem:[%s5241_s3 + $0x64] ss:$12 sps:$4 sm:$0xff]   ;;  %v4033_v16 = vld [vmem:[%s5241_s3 + $0x60] ss:$12 sps:$4 sm:$0xff]   ;;  %v4050_v20 = vld [vmem:[%s5241_s3 + $0x48] ss:$12 sps:$4 sm:$0xff]  }
   0x7   :  { %225 = vmatpush1.bf16.msra.mxu1 %v3619_v7  ;;  %v3633_v17 = vld [vmem:[%s5240_s2 + $0x4c] ss:$12 sps:$4 sm:$0xff]   ;;  %v3639_v21 = vld [vmem:[%s5240_s2 + $0x34] ss:$12 sps:$4 sm:$0xff]   ;;  %v3643_v23 = vld [vmem:[%s5240_s2 + $0x30] ss:$12 sps:$4 sm:$0xff]  }
   0x8   :  { %568 = vmatpush1.bf16.msra.mxu0 %v3997_v8  ;;  %226 = vmatprep.subr.bf16.mxu1 %v3621_v9  ;;  %v4042_v18 = vld [vmem:[%s5241_s3 + $0x4c] ss:$12 sps:$4 sm:$0xff]   ;;  %v4060_v22 = vld [vmem:[%s5241_s3 + $0x34] ss:$12 sps:$4 sm:$0xff]   ;;  %v4069_v24 = vld [vmem:[%s5241_s3 + $0x30] ss:$12 sps:$4 sm:$0xff]  }
   0x9   :  { %569 = vmatprep.subr.bf16.mxu0 %v4006_v10  ;;  %v3645_v25 = vld [vmem:[%s5240_s2 + $0x1c] ss:$12 sps:$4 sm:$0xff]   ;;  %v3649_v27 = vld [vmem:[%s5240_s2 + $0x18] ss:$12 sps:$4 sm:$0xff]   ;;  %v3655_v31 = vld [vmem:[%s5240_s2] ss:$12 sps:$4 sm:$0xff]  }
   0xa   :  { %v4078_v26 = vld [vmem:[%s5241_s3 + $0x1c] ss:$12 sps:$4 sm:$0xff]   ;;  %v4087_v28 = vld [vmem:[%s5241_s3 + $0x18] ss:$12 sps:$4 sm:$0xff]   ;;  %v4104_v32 = vld [vmem:[%s5241_s3] ss:$12 sps:$4 sm:$0xff]  }
   0xb   :  { %227 = vmatpush1.bf16.msra.mxu1 %v3625_v11  ;;  %v3651_v29 = vld [vmem:[%s5240_s2 + $0x4] ss:$12 sps:$4 sm:$0xff]   ;;  %v34_v34 = vld [vmem:[%s5242_s0 + $0x8] sm:$0xff]  ;;  %v36_v41 = vld [vmem:[%s5242_s0 + $0x18] sm:$0xff] }
   0xc   :  { %570 = vmatpush1.bf16.msra.mxu0 %v4014_v12  ;;  %228 = vmatprep.subr.bf16.mxu1 %v3627_v13  ;;  %v4096_v30 = vld [vmem:[%s5241_s3 + $0x4] ss:$12 sps:$4 sm:$0xff]   ;;  %v3659_v42 = vld [vmem:[%s5240_s2 + $0x80] ss:$12 sps:$4 sm:$0xff]   ;;  %v3660_v44 = vld [vmem:[%s5240_s2 + $0x68] ss:$12 sps:$4 sm:$0xff]  }
   0xd   :  { %571 = vmatprep.subr.bf16.mxu0 %v4024_v14  ;;  %v33_v33 = vld [vmem:[%s5242_s0] sm:$0xff]  ;;  %v3657_v36 = vld [vmem:[%s5240_s2 + $0xb0] ss:$12 sps:$4 sm:$0xff]   ;;  %v38_v46 = vld [vmem:[%s5242_s0 + $0x28] sm:$0xff] }
   0xe   :  { %v4116_v35 = vld [vmem:[%s5243_s1] sm:$0xff]  ;;  %v41_v37 = vpack.c.bf16 %v34_v34, %v33_v33  ;;  %v35_v40 = vld [vmem:[%s5242_s0 + $0x10] sm:$0xff]  ;;  %v40_v51 = vld [vmem:[%s5242_s0 + $0x38] sm:$0xff] }
   0xf   :  { %229 = vmatpush1.bf16.msra.mxu1 %v3631_v15  ;;  %v4124_v38 = vpack.c.bf16 %v4116_v35, %v4116_v35  ;;  %v3658_v39 = vld [vmem:[%s5240_s2 + $0x98] ss:$12 sps:$4 sm:$0xff]   ;;  %v42_v43 = vpack.c.bf16 %v36_v41, %v35_v40  ;;  %v3661_v47 = vld [vmem:[%s5240_s2 + $0x50] ss:$12 sps:$4 sm:$0xff]   ;;  %v3663_v52 = vld [vmem:[%s5240_s2 + $0x20] ss:$12 sps:$4 sm:$0xff]   ;;  %v79_v15 = vlaneseq }
  0x10   :  { %572 = vmatpush1.bf16.msra.mxu0 %v4033_v16  ;;  %230 = vmatprep.subr.bf16.mxu1 %v3633_v17  ;;  %v37_v45 = vld [vmem:[%s5242_s0 + $0x20] sm:$0xff]  ;;  %v39_v50 = vld [vmem:[%s5242_s0 + $0x30] sm:$0xff] }
  0x11   :  { %573 = vmatprep.subr.bf16.mxu0 %v4042_v18  ;;  %v43_v48 = vpack.c.bf16 %v38_v46, %v37_v45  ;;  %v3662_v49 = vld [vmem:[%s5240_s2 + $0x38] ss:$12 sps:$4 sm:$0xff]   ;;  %v44_v53 = vpack.c.bf16 %v40_v51, %v39_v50  ;;  %v3664_v54 = vld [vmem:[%s5240_s2 + $0x8] ss:$12 sps:$4 sm:$0xff]   ;;  %v3665_v55 = vld [vmem:[%s5241_s3 + $0xb0] ss:$12 sps:$4 sm:$0xff]  }
  0x12   :  { %v3666_v57 = vld [vmem:[%s5241_s3 + $0x98] ss:$12 sps:$4 sm:$0xff]   ;;  %v3667_v58 = vld [vmem:[%s5241_s3 + $0x80] ss:$12 sps:$4 sm:$0xff]   ;;  %v3668_v59 = vld [vmem:[%s5241_s3 + $0x68] ss:$12 sps:$4 sm:$0xff]  }
  0x13   :  { %231 = vmatpush1.bf16.msra.mxu1 %v3637_v19  ;;  %v3669_v60 = vld [vmem:[%s5241_s3 + $0x50] ss:$12 sps:$4 sm:$0xff]   ;;  %v3670_v61 = vld [vmem:[%s5241_s3 + $0x38] ss:$12 sps:$4 sm:$0xff]   ;;  %v3671_v62 = vld [vmem:[%s5241_s3 + $0x20] ss:$12 sps:$4 sm:$0xff]  }
  0x14   :  { %574 = vmatpush1.bf16.msra.mxu0 %v4050_v20  ;;  %232 = vmatprep.subr.bf16.mxu1 %v3639_v21  ;;  %v3672_v63 = vld [vmem:[%s5241_s3 + $0x8] ss:$12 sps:$4 sm:$0xff]   ;;  %v3673_v0 = vld [vmem:[%s5241_s3 + $0xb0] ss:$12 sps:$4 sm:$0xff]   ;;  %v3675_v3 = vld [vmem:[%s5241_s3 + $0x80] ss:$12 sps:$4 sm:$0xff]  }
  0x15   :  { %575 = vmatprep.subr.bf16.mxu0 %v4060_v22  ;;  %v3676_v5 = vld [vmem:[%s5241_s3 + $0x68] ss:$12 sps:$4 sm:$0xff]   ;;  %v3677_v7 = vld [vmem:[%s5241_s3 + $0x50] ss:$12 sps:$4 sm:$0xff]   ;;  %v3678_v9 = vld [vmem:[%s5241_s3 + $0x38] ss:$12 sps:$4 sm:$0xff]  }
  0x16   :  { %v3679_v11 = vld [vmem:[%s5241_s3 + $0x20] ss:$12 sps:$4 sm:$0xff]   ;;  %v3680_v13 = vld [vmem:[%s5241_s3 + $0x8] ss:$12 sps:$4 sm:$0xff]   ;;  %v4259_v17 = vshrl.u32 %v79_v15, 7 }
  0x17   :  { %233 = vmatpush1.bf16.msra.mxu1 %v3643_v23  ;;  %v77_v21 = vld [vmem:[%s5244_s4] sm:$0x7] }
  0x18   :  { %576 = vmatpush1.bf16.msra.mxu0 %v4069_v24  ;;  %234 = vmatprep.subr.bf16.mxu1 %v3645_v25  ;;  %v4262_v19 = vsub.s32 0, %v4259_v17 }
  0x19   :  { %577 = vmatprep.subr.bf16.mxu0 %v4078_v26 }
  0x1a   :  { %v82_v33 = vrot.slane %v77_v21, %v4262_v19 }
  0x1b   :  { %235 = vmatpush1.bf16.msra.mxu1 %v3649_v27  ;;  %v4268_v27 = vsub.s32 1, %v4259_v17 }
  0x1c   :  { %578 = vmatpush1.bf16.msra.mxu0 %v4087_v28  ;;  %236 = vmatprep.subr.bf16.mxu1 %v3651_v29 }
  0x1d   :  { %579 = vmatprep.subr.bf16.mxu0 %v4096_v30 }
  0x1f   :  { %237 = vmatpush1.bf16.msra.mxu1 %v3655_v31 }
  0x20   :  { %580 = vmatpush1.bf16.msra.mxu0 %v4104_v32  ;;  %3422 = vmatprep.subr.bf16.mxu1 %v3657_v36 }
  0x21   :  { %834 = vmatprep.subr.bf16.mxu0 %v3971_v2 }
  0x22   :  { %255 = vmatmul.mubr.bf16.vlgmr.msra.gmra.mxu1 %v41_v37 }
  0x23   :  { %598 = vmatmul.mubr.bf16.vlgmr.msra.gmra.mxu0 %v4124_v38  ;;  %3423 = vmatpush3.bf16.msra.mxu1 %v3657_v36 }
  0x24   :  { %264 = vmatprep.mubr.bf16.mxu1 %v3905_v1  ;;  %3424 = vmatprep.subr.bf16.mxu1 %v3658_v39 }
  0x25   :  { %835 = vmatpush1.bf16.msra.mxu0 %v3979_v4  ;;  %866 = vmatprep.mubr.bf16.mxu0 %v3905_v1 }
  0x26   :  { %836 = vmatprep.subr.bf16.mxu0 %v3989_v6 }
  0x27   :  { %3425 = vmatpush3.bf16.msra.mxu1 %v3658_v39 }
  0x28   :  { %3426 = vmatprep.subr.bf16.mxu1 %v3659_v42 }
  0x29   :  { %837 = vmatpush1.bf16.msra.mxu0 %v3997_v8 }
  0x2a   :  { %838 = vmatprep.subr.bf16.mxu0 %v4006_v10  ;;  %265 = vmatmul.mubr.bf16.gmra.mxu1 %v42_v43 }
  0x2b   :  { %3427 = vmatpush3.bf16.msra.mxu1 %v3659_v42  ;;  %274 = vmatprep.mubr.bf16.mxu1 %v3905_v1 }
  0x2c   :  { %3428 = vmatprep.subr.bf16.mxu1 %v3660_v44 }
  0x2d   :  { %839 = vmatpush1.bf16.msra.mxu0 %v4014_v12 }
  0x2e   :  { %840 = vmatprep.subr.bf16.mxu0 %v4024_v14 }
  0x2f   :  { %3429 = vmatpush3.bf16.msra.mxu1 %v3660_v44 }
  0x30   :  { %3430 = vmatprep.subr.bf16.mxu1 %v3661_v47 }
  0x31   :  { %841 = vmatpush1.bf16.msra.mxu0 %v4033_v16 }
  0x32   :  { %842 = vmatprep.subr.bf16.mxu0 %v4042_v18  ;;  %275 = vmatmul.mubr.bf16.gmra.mxu1 %v43_v48 }
  0x33   :  { %3431 = vmatpush3.bf16.msra.mxu1 %v3661_v47  ;;  %284 = vmatprep.mubr.bf16.mxu1 %v3905_v1 }
  0x34   :  { %3432 = vmatprep.subr.bf16.mxu1 %v3662_v49 }
  0x35   :  { %843 = vmatpush1.bf16.msra.mxu0 %v4050_v20 }
  0x36   :  { %844 = vmatprep.subr.bf16.mxu0 %v4060_v22 }
  0x37   :  { %3433 = vmatpush3.bf16.msra.mxu1 %v3662_v49 }
  0x38   :  { %3434 = vmatprep.subr.bf16.mxu1 %v3663_v52 }
  0x39   :  { %845 = vmatpush1.bf16.msra.mxu0 %v4069_v24 }
  0x3a   :  { %846 = vmatprep.subr.bf16.mxu0 %v4078_v26  ;;  %285 = vmatmul.mubr.bf16.gmra.mxu1 %v44_v53 }
  0x3b   :  { %3435 = vmatpush3.bf16.msra.mxu1 %v3663_v52  ;;  %3438 = vmatprep.mubr.bf16.mxu1 %v41_v37  ;;  %v86_v37 = vrot.slane %v77_v21, %v4268_v27 }
  0x3c   :  { %3436 = vmatprep.subr.bf16.mxu1 %v3664_v54 }
  0x3d   :  { %847 = vmatpush1.bf16.msra.mxu0 %v4087_v28 }
  0x3e   :  { %848 = vmatprep.subr.bf16.mxu0 %v4096_v30 }
  0x3f   :  { %3437 = vmatpush3.bf16.msra.mxu1 %v3664_v54 }
  0x40   :  { %3446 = vmatprep.subr.bf16.mxu1 %v3906_v56 }
  0x41   :  { %849 = vmatpush1.bf16.msra.mxu0 %v4104_v32 }
  0x42   :  { %1105 = vmatprep.subr.bf16.mxu0 %v3971_v2  ;;  %3439 = vmatmul.mubr.bf16.vlgmr.msra.gmra.mxu1 %v42_v43  ;;  %v3674_v2 = vld [vmem:[%s5241_s3 + $0x98] ss:$12 sps:$4 sm:$0xff]  }
  0x43   :  { %3447 = vmatpush3.bf16.msra.mxu1 %v3665_v55  ;;  %3442 = vmatprep.mubr.bf16.mxu1 %v43_v48  ;;  %v384_v48 = vld [vmem:[%s5245_s5] sm:$0x7] }
  0x44   :  { %3448 = vmatprep.subr.bf16.mxu1 %v3906_v56  ;;  %v4288_v52 = vrot.slane %v384_v48, %v4262_v19 }
  0x47   :  { %3449 = vmatpush3.bf16.msra.mxu1 %v3666_v57 }
  0x48   :  { %3450 = vmatprep.subr.bf16.mxu1 %v3906_v56 }
  0x4a   :  { %3443 = vmatmul.mubr.bf16.gmra.mxu1 %v44_v53 }
  0x4b   :  { %3451 = vmatpush3.bf16.msra.mxu1 %v3667_v58  ;;  %3462 = vmatprep.mubr.msk.bf16.mxu1 %vm3907_vm0, %v3906_v56 }
  0x4c   :  { %3452 = vmatprep.subr.bf16.mxu1 %v3906_v56 }
  0x4f   :  { %3453 = vmatpush3.bf16.msra.mxu1 %v3668_v59 }
  0x50   :  { %3454 = vmatprep.subr.bf16.mxu1 %v3906_v56 }
  0x53   :  { %3455 = vmatpush3.bf16.msra.mxu1 %v3669_v60 }
  0x54   :  { %3456 = vmatprep.subr.bf16.mxu1 %v3906_v56 }
  0x57   :  { %3457 = vmatpush3.bf16.msra.mxu1 %v3670_v61 }
  0x58   :  { %3458 = vmatprep.subr.bf16.mxu1 %v3906_v56 }
  0x5b   :  { %3459 = vmatpush3.bf16.msra.mxu1 %v3671_v62 }
  0x5c   :  { %3460 = vmatprep.subr.bf16.mxu1 %v3906_v56 }
  0x5f   :  { %3461 = vmatpush3.bf16.msra.mxu1 %v3672_v63 }
  0x60   :  { %3466 = vmatprep.subr.bf16.mxu1 %v3906_v56 }
  0x62   :  { %3463 = vmatmul.mubr.bf16.vlgmr.msra.gmra.mxu1 %v4124_v38 }
  0x63   :  { %3482 = vmatprep.mubr.msk.bf16.mxu1 %vm3907_vm0, %v3906_v56  ;;  %3467 = vmatpush3.bf16.msra.mxu1 %v3673_v0 }
  0x64   :  { %3468 = vmatprep.subr.bf16.mxu1 %v3906_v56 }
  0x67   :  { %3469 = vmatpush3.bf16.msra.mxu1 %v3674_v2 }
  0x68   :  { %3470 = vmatprep.subr.bf16.mxu1 %v3906_v56 }
  0x6b   :  { %3471 = vmatpush3.bf16.msra.mxu1 %v3675_v3  ;;  %v89_v3 = vsub.s32 2, %v4259_v17 }
  0x6c   :  { %3472 = vmatprep.subr.bf16.mxu1 %v3906_v56 }
  0x6f   :  { %3473 = vmatpush3.bf16.msra.mxu1 %v3676_v5 }
  0x70   :  { %3474 = vmatprep.subr.bf16.mxu1 %v3906_v56 }
  0x73   :  { %3475 = vmatpush3.bf16.msra.mxu1 %v3677_v7 }
  0x74   :  { %3476 = vmatprep.subr.bf16.mxu1 %v3906_v56 }
  0x77   :  { %3477 = vmatpush3.bf16.msra.mxu1 %v3678_v9 }
  0x78   :  { %3478 = vmatprep.subr.bf16.mxu1 %v3906_v56 }
  0x7b   :  { %3479 = vmatpush3.bf16.msra.mxu1 %v3679_v11 }
  0x7c   :  { %3480 = vmatprep.subr.bf16.mxu1 %v3906_v56 }
  0x7f   :  { %3481 = vmatpush3.bf16.msra.mxu1 %v3680_v13 }
  0x80   :  { %3486 = vmatprep.subr.bf16.mxu1 %v3906_v56 }
  0xe2   :  { %v256_v23 = vpop.f32.mrf.mxu1 }
  0xe3   :  { %v599_v25 = vpop.f32.mrf.mxu0  ;;  %v257_v58 = vadd.f32 %v256_v23, %v82_v33  ;;  %v90_v23 = vrot.slane %v77_v21, %v89_v3 }
  0xe4   :  { %v258_v29 = vpop.f32.mrf.mxu1  ;;  %v600_v59 = vadd.f32 %v599_v25, %v4288_v52 }
  0xe5   :  { %v601_v31 = vpop.f32.mrf.mxu0  ;;  %v259_v17 = vadd.f32 %v258_v29, %v86_v37 }
  0xe6   :  { %v260_v34 = vpop.f32.mrf.mxu1  ;;  %v649_v0 = vadd.f32 %v600_v59, %v257_v58 }
  0xe7   :  { %v603_v36 = vpop.f32.mrf.mxu0  ;;  %v4272_v38 = vadd.f32 %v260_v34, %v82_v33  ;;  %v4307_v34 = vrot.slane %v384_v48, %v4268_v27 }
  0xe8   :  { %v262_v39 = vpop.f32.mrf.mxu1  ;;  %v3138_v11 = vmul.f32 -1.442695, %v649_v0 }
  0xe9   :  { %v604_v40 = vpop.f32.mrf.mxu0  ;;  %v4274_v41 = vadd.f32 %v262_v39, %v86_v37 }
  0xea   :  { %v266_v42 = vpop.f32.mrf.mxu1  ;;  %3777 = vpow2.f32 %v3138_v11  ;;  %v4326_v11 = vrot.slane %v384_v48, %v89_v3 }
  0xeb   :  { %v4276_v43 = vadd.f32 %v266_v42, %v82_v33 }
  0xec   :  { %v268_v44 = vpop.f32.mrf.mxu1 }
  0xed   :  { %v4278_v45 = vadd.f32 %v268_v44, %v86_v37  ;;  %v602_v44 = vadd.f32 %v601_v31, %v4307_v34 }
  0xee   :  { %v270_v46 = vpop.f32.mrf.mxu1 }
  0xef   :  { %v4280_v47 = vadd.f32 %v270_v46, %v82_v33 }
  0xf0   :  { %v272_v49 = vpop.f32.mrf.mxu1 }
  0xf1   :  { %v4285_v50 = vadd.f32 %v272_v49, %v86_v37 }
  0xf2   :  { %v276_v51 = vpop.f32.mrf.mxu1 }
  0xf3   :  { %v4290_v53 = vadd.f32 %v276_v51, %v82_v33  ;;  %v656_v51 = vadd.f32 %v602_v44, %v259_v17 }
  0xf4   :  { %v278_v54 = vpop.f32.mrf.mxu1 }
  0xf5   :  { %v4292_v55 = vadd.f32 %v278_v54, %v86_v37  ;;  %v3139_v59 = vmul.f32 -1.442695, %v656_v51 }
  0xf6   :  { %v280_v57 = vpop.f32.mrf.mxu1 }
  0xf7   :  { %v4295_v60 = vadd.f32 %v280_v57, %v82_v33  ;;  %v3778_v29 = vpop.eup %3777  ;;  %3779 = vpow2.f32 %v3139_v59 }
  0xf8   :  { %v282_v61 = vpop.f32.mrf.mxu1 }
  0xf9   :  { %v4297_v62 = vadd.f32 %v282_v61, %v86_v37 }
  0xfa   :  { %v286_v63 = vpop.f32.mrf.mxu1 }
  0xfb   :  { %v4299_v2 = vadd.f32 %v286_v63, %v82_v33 }
  0xfc   :  { %v288_v5 = vpop.f32.mrf.mxu1 }
  0xfd   :  { %v4302_v7 = vadd.f32 %v288_v5, %v86_v37  ;;  %v653_v5 = vadd.f32 1.0, %v3778_v29 }
  0xfe   :  { %v290_v9 = vpop.f32.mrf.mxu1 }
  0xff   :  { %v4304_v13 = vadd.f32 %v290_v9, %v82_v33  ;;  %3781 = vrcp.f32 %v653_v5 }
 0x100   :  { %v292_v25 = vpop.f32.mrf.mxu1 }
 0x101   :  { %v4309_v36 = vadd.f32 %v292_v25, %v86_v37 }
 0x102   :  { %v3440_v39 = vpop.f32.mrf.mxu1 }
 0x103   :  { %v4311_v40 = vadd.f32 %v3440_v39, %v90_v23 }
 0x104   :  { %v329_v42 = vpop.f32.mrf.mxu1  ;;  %v3780_v9 = vpop.eup %3779 }
 0x105   :  { %v660_v25 = vadd.f32 1.0, %v3780_v9 }
 0x106   :  { %v3441_v46 = vpop.f32.mrf.mxu1 }
 0x107   :  { %v4314_v49 = vadd.f32 %v3441_v46, %v90_v23  ;;  %3783 = vrcp.f32 %v660_v25 }
 0x108   :  { %v332_v33 = vpop.f32.mrf.mxu1 }
 0x109   :  { %v4316_v21 = vadd.f32 %v332_v33, %v90_v23  ;;  %v330_v33 = vadd.f32 %v329_v42, %v90_v23 }
 0x10a   :  { %v3444_v54 = vpop.f32.mrf.mxu1 }
 0x10b   :  { %v4318_v57 = vadd.f32 %v3444_v54, %v90_v23 }
 0x10c   :  { %v345_v58 = vpop.f32.mrf.mxu1  ;;  %v3782_v44 = vpop.eup %3781 }
 0x10d   :  { %v4320_v61 = vadd.f32 %v345_v58, %v90_v23 }
 0x10e   :  { %v3445_v63 = vpop.f32.mrf.mxu1 }
 0x10f   :  { %v4322_v0 = vadd.f32 %v3445_v63, %v90_v23 }
 0x110   :  { %v348_v37 = vpop.f32.mrf.mxu1 }
 0x111   :  { %v4324_v31 = vadd.f32 %v348_v37, %v90_v23 }
 0x114   :  { %v3784_v59 = vpop.eup %3783 }
 0x115   :  { %v666_v37 = vsub.f32 1.0, %v3784_v59  ;;  %v668_v48 = vmul.f32 %v3784_v59, %v4116_v35 }
 0x122   :  { %v640_v39 = vpop.f32.mrf.mxu1 }
 0x123   :  { %v641_v17 = vadd.f32 %v640_v39, %v4326_v11 }
 0x124   :  { %v3464_v46 = vpop.f32.mrf.mxu1 }
 0x125   :  { %v663_v51 = vmul.f32 %v3782_v44, %v641_v17 }
 0x126   :  { %v643_v54 = vpop.f32.mrf.mxu1 }
 0x127   :  { %v664_v58 = vadd.f32 %v663_v51, %v330_v33 }
 0x128   :  { %v3465_v63 = vpop.f32.mrf.mxu1 }
 0x129   :  { %3785 = vtanh.f32 %v664_v58 }
 0x136   :  { %v3786_v29 = vpop.eup %3785 }
 0x137   :  { %v667_v5 = vmul.f32 %v3786_v29, %v666_v37 }
 0x139   :  { %v4330_v3 = vadd.f32 %v668_v48, %v667_v5 }
 0x13b   :  { %v673_v9 = vpack.c.bf16 %v4330_v3, %v4330_v3 }
 0x13d   :  { %867 = vmatmul.mubr.bf16.vlgmr.msra.gmra.mxu0 %v673_v9  ;;  %3483 = vmatmul.mubr.bf16.vlgmr.msra.gmra.mxu1 %v673_v9 }
 0x13e   :  { %1106 = vmatpush1.bf16.msra.mxu0 %v3979_v4  ;;  %1137 = vmatprep.mubr.bf16.mxu0 %v3905_v1  ;;  %v3681_v4 = vld [vmem:[%s5241_s3 + $0xb0] ss:$12 sps:$4 sm:$0xff]  }
 0x13f   :  { %1107 = vmatprep.subr.bf16.mxu0 %v3989_v6  ;;  %3502 = vmatprep.mubr.msk.bf16.mxu1 %vm3907_vm0, %v3906_v56  ;;  %v3682_v6 = vld [vmem:[%s5241_s3 + $0x98] ss:$12 sps:$4 sm:$0xff]  }
 0x140   :  { %3487 = vmatpush3.bf16.msra.mxu1 %v3681_v4 }
 0x141   :  { %3488 = vmatprep.subr.bf16.mxu1 %v3906_v56 }
 0x142   :  { %1108 = vmatpush1.bf16.msra.mxu0 %v3997_v8  ;;  %v3683_v8 = vld [vmem:[%s5241_s3 + $0x80] ss:$12 sps:$4 sm:$0xff]  }
 0x143   :  { %1109 = vmatprep.subr.bf16.mxu0 %v4006_v10  ;;  %v3684_v10 = vld [vmem:[%s5241_s3 + $0x68] ss:$12 sps:$4 sm:$0xff]  }
 0x144   :  { %3489 = vmatpush3.bf16.msra.mxu1 %v3682_v6  ;;  %v4406_v6 = vld [vmem:[%s5241_s3 + $0xa8] ss:$12 sps:$4 sm:$0xff]  }
 0x145   :  { %3490 = vmatprep.subr.bf16.mxu1 %v3906_v56 }
 0x146   :  { %1110 = vmatpush1.bf16.msra.mxu0 %v4014_v12  ;;  %v3685_v12 = vld [vmem:[%s5241_s3 + $0x50] ss:$12 sps:$4 sm:$0xff]  }
 0x147   :  { %1111 = vmatprep.subr.bf16.mxu0 %v4024_v14  ;;  %v3686_v14 = vld [vmem:[%s5241_s3 + $0x38] ss:$12 sps:$4 sm:$0xff]  }
 0x148   :  { %3491 = vmatpush3.bf16.msra.mxu1 %v3683_v8  ;;  %v3692_v8 = vld [vmem:[%s5241_s3 + $0xb0] ss:$12 sps:$4 sm:$0xff]  }
 0x149   :  { %3492 = vmatprep.subr.bf16.mxu1 %v3906_v56 }
 0x14a   :  { %1112 = vmatpush1.bf16.msra.mxu0 %v4033_v16  ;;  %v3687_v16 = vld [vmem:[%s5241_s3 + $0x20] ss:$12 sps:$4 sm:$0xff]  }
 0x14b   :  { %1113 = vmatprep.subr.bf16.mxu0 %v4042_v18  ;;  %v3688_v18 = vld [vmem:[%s5241_s3 + $0x8] ss:$12 sps:$4 sm:$0xff]  }
 0x14c   :  { %3493 = vmatpush3.bf16.msra.mxu1 %v3684_v10  ;;  %v4416_v10 = vld [vmem:[%s5241_s3 + $0x94] ss:$12 sps:$4 sm:$0xff]  }
 0x14d   :  { %3494 = vmatprep.subr.bf16.mxu1 %v3906_v56 }
 0x14e   :  { %1114 = vmatpush1.bf16.msra.mxu0 %v4050_v20 }
 0x14f   :  { %1115 = vmatprep.subr.bf16.mxu0 %v4060_v22 }
 0x150   :  { %3495 = vmatpush3.bf16.msra.mxu1 %v3685_v12  ;;  %v4422_v12 = vld [vmem:[%s5241_s3 + $0x90] ss:$12 sps:$4 sm:$0xff]  }
 0x151   :  { %3496 = vmatprep.subr.bf16.mxu1 %v3906_v56 }
 0x152   :  { %1116 = vmatpush1.bf16.msra.mxu0 %v4069_v24 }
 0x153   :  { %1117 = vmatprep.subr.bf16.mxu0 %v4078_v26 }
 0x154   :  { %3497 = vmatpush3.bf16.msra.mxu1 %v3686_v14  ;;  %v3696_v14 = vld [vmem:[%s5241_s3 + $0x98] ss:$12 sps:$4 sm:$0xff]  }
 0x155   :  { %3498 = vmatprep.subr.bf16.mxu1 %v3906_v56 }
 0x156   :  { %1118 = vmatpush1.bf16.msra.mxu0 %v4087_v28 }
 0x157   :  { %1119 = vmatprep.subr.bf16.mxu0 %v4096_v30 }
 0x158   :  { %3499 = vmatpush3.bf16.msra.mxu1 %v3687_v16  ;;  %v4432_v16 = vld [vmem:[%s5241_s3 + $0x7c] ss:$12 sps:$4 sm:$0xff]  }
 0x159   :  { %3500 = vmatprep.subr.bf16.mxu1 %v3906_v56 }
 0x15a   :  { %1120 = vmatpush1.bf16.msra.mxu0 %v4104_v32 }
 0x15c   :  { %3501 = vmatpush3.bf16.msra.mxu1 %v3688_v18  ;;  %v4438_v18 = vld [vmem:[%s5241_s3 + $0x78] ss:$12 sps:$4 sm:$0xff]  }
 0x15d   :  { %3506 = vmatprep.subr.bf16.mxu1 %v3906_v56 }
 0x1fd   :  { %v868_v20 = vpop.f32.mrf.mxu0  ;;  %v909_v22 = vpop.f32.mrf.mxu1 }
 0x1fe   :  { %v869_v24 = vadd.f32 %v868_v20, %v4288_v52  ;;  %v910_v58 = vadd.f32 %v909_v22, %v4326_v11  ;;  %v3700_v20 = vld [vmem:[%s5241_s3 + $0x80] ss:$12 sps:$4 sm:$0xff]   ;;  %v4448_v22 = vld [vmem:[%s5241_s3 + $0x64] ss:$12 sps:$4 sm:$0xff]  }
 0x1ff   :  { %v870_v26 = vpop.f32.mrf.mxu0  ;;  %v3484_v28 = vpop.f32.mrf.mxu1 }
 0x200   :  { %v919_v30 = vadd.f32 %v869_v24, %v4272_v38  ;;  %v871_v42 = vadd.f32 %v870_v26, %v4307_v34  ;;  %v4454_v24 = vld [vmem:[%s5241_s3 + $0x60] ss:$12 sps:$4 sm:$0xff]   ;;  %v3704_v26 = vld [vmem:[%s5241_s3 + $0x68] ss:$12 sps:$4 sm:$0xff]  }
 0x201   :  { %v872_v32 = vpop.f32.mrf.mxu0  ;;  %v912_v35 = vpop.f32.mrf.mxu1  ;;  %v4463_v28 = vld [vmem:[%s5241_s3 + $0x4c] ss:$12 sps:$4 sm:$0xff]  }
 0x202   :  { %v3164_v23 = vmul.f32 -1.442695, %v919_v30  ;;  %v926_v17 = vadd.f32 %v871_v42, %v4274_v41  ;;  %v4469_v30 = vld [vmem:[%s5241_s3 + $0x48] ss:$12 sps:$4 sm:$0xff]   ;;  %v3708_v32 = vld [vmem:[%s5241_s3 + $0x50] ss:$12 sps:$4 sm:$0xff]  }
 0x203   :  { %v873_v25 = vpop.f32.mrf.mxu0  ;;  %v3485_v39 = vpop.f32.mrf.mxu1  ;;  %v4479_v35 = vld [vmem:[%s5241_s3 + $0x34] ss:$12 sps:$4 sm:$0xff]   ;;  %v3712_v42 = vld [vmem:[%s5241_s3 + $0x38] ss:$12 sps:$4 sm:$0xff]  }
 0x204   :  { %3787 = vpow2.f32 %v3164_v23  ;;  %v3165_v44 = vmul.f32 -1.442695, %v926_v17  ;;  %v4485_v23 = vld [vmem:[%s5241_s3 + $0x30] ss:$12 sps:$4 sm:$0xff]   ;;  %v4501_v39 = vld [vmem:[%s5241_s3 + $0x18] ss:$12 sps:$4 sm:$0xff]  }
 0x205   :  { %v4495_v25 = vld [vmem:[%s5241_s3 + $0x1c] ss:$12 sps:$4 sm:$0xff]   ;;  %v3716_v17 = vld [vmem:[%s5241_s3 + $0x20] ss:$12 sps:$4 sm:$0xff]  }
 0x206   :  { %3789 = vpow2.f32 %v3165_v44  ;;  %v4511_v44 = vld [vmem:[%s5241_s3 + $0x4] ss:$12 sps:$4 sm:$0xff]  }
 0x211   :  { %v3788_v46 = vpop.eup %3787 }
 0x212   :  { %v923_v33 = vadd.f32 1.0, %v3788_v46  ;;  %v4517_v46 = vld [vmem:[%s5241_s3] ss:$12 sps:$4 sm:$0xff]  }
 0x213   :  { %v3790_v51 = vpop.eup %3789 }
 0x214   :  { %3791 = vrcp.f32 %v923_v33  ;;  %v930_v54 = vadd.f32 1.0, %v3790_v51  ;;  %v3720_v33 = vld [vmem:[%s5241_s3 + $0x8] ss:$12 sps:$4 sm:$0xff]  }
 0x216   :  { %3793 = vrcp.f32 %v930_v54 }
 0x221   :  { %v3792_v38 = vpop.eup %3791 }
 0x222   :  { %v933_v63 = vmul.f32 %v3792_v38, %v910_v58 }
 0x223   :  { %v3794_v37 = vpop.eup %3793 }
 0x224   :  { %v934_v59 = vadd.f32 %v933_v63, %v4316_v21  ;;  %v936_v29 = vsub.f32 1.0, %v3794_v37  ;;  %v938_v41 = vmul.f32 %v3794_v37, %v4330_v3  ;;  %v4401_v21 = vld [vmem:[%s5241_s3 + $0xac] ss:$12 sps:$4 sm:$0xff]  }
 0x225   :  { %1376 = vmatprep.subr.bf16.mxu0 %v4401_v21 }
 0x226   :  { %3795 = vtanh.f32 %v934_v59 }
 0x233   :  { %v3796_v5 = vpop.eup %3795 }
 0x234   :  { %v937_v48 = vmul.f32 %v3796_v5, %v936_v29 }
 0x236   :  { %v4391_v9 = vadd.f32 %v938_v41, %v937_v48 }
 0x238   :  { %v944_v4 = vpack.c.bf16 %v4391_v9, %v4391_v9 }
 0x23a   :  { %1138 = vmatmul.mubr.bf16.vlgmr.msra.gmra.mxu0 %v944_v4  ;;  %3503 = vmatmul.mubr.bf16.vlgmr.msra.gmra.mxu1 %v944_v4 }
 0x23b   :  { %1408 = vmatprep.mubr.bf16.mxu0 %v3905_v1  ;;  %3522 = vmatprep.mubr.msk.bf16.mxu1 %vm3907_vm0, %v3906_v56 }
 0x23c   :  { %1377 = vmatpush1.bf16.msra.mxu0 %v4406_v6  ;;  %3507 = vmatpush3.bf16.msra.mxu1 %v3692_v8 }
 0x23d   :  { %3508 = vmatprep.subr.bf16.mxu1 %v3906_v56  ;;  %1378 = vmatprep.subr.bf16.mxu0 %v4416_v10 }
 0x240   :  { %1379 = vmatpush1.bf16.msra.mxu0 %v4422_v12  ;;  %3509 = vmatpush3.bf16.msra.mxu1 %v3696_v14 }
 0x241   :  { %3510 = vmatprep.subr.bf16.mxu1 %v3906_v56  ;;  %1380 = vmatprep.subr.bf16.mxu0 %v4432_v16 }
 0x244   :  { %1381 = vmatpush1.bf16.msra.mxu0 %v4438_v18  ;;  %3511 = vmatpush3.bf16.msra.mxu1 %v3700_v20 }
 0x245   :  { %3512 = vmatprep.subr.bf16.mxu1 %v3906_v56  ;;  %1382 = vmatprep.subr.bf16.mxu0 %v4448_v22 }
 0x248   :  { %1383 = vmatpush1.bf16.msra.mxu0 %v4454_v24  ;;  %3513 = vmatpush3.bf16.msra.mxu1 %v3704_v26 }
 0x249   :  { %1384 = vmatprep.subr.bf16.mxu0 %v4463_v28  ;;  %3514 = vmatprep.subr.bf16.mxu1 %v3906_v56 }
 0x24c   :  { %1385 = vmatpush1.bf16.msra.mxu0 %v4469_v30  ;;  %3515 = vmatpush3.bf16.msra.mxu1 %v3708_v32 }
 0x24d   :  { %1386 = vmatprep.subr.bf16.mxu0 %v4479_v35  ;;  %3516 = vmatprep.subr.bf16.mxu1 %v3906_v56 }
 0x250   :  { %1387 = vmatpush1.bf16.msra.mxu0 %v4485_v23  ;;  %3517 = vmatpush3.bf16.msra.mxu1 %v3712_v42 }
 0x251   :  { %1388 = vmatprep.subr.bf16.mxu0 %v4495_v25  ;;  %3518 = vmatprep.subr.bf16.mxu1 %v3906_v56 }
 0x254   :  { %1389 = vmatpush1.bf16.msra.mxu0 %v4501_v39  ;;  %3519 = vmatpush3.bf16.msra.mxu1 %v3716_v17 }
 0x255   :  { %1390 = vmatprep.subr.bf16.mxu0 %v4511_v44  ;;  %3520 = vmatprep.subr.bf16.mxu1 %v3906_v56 }
 0x258   :  { %1391 = vmatpush1.bf16.msra.mxu0 %v4517_v46  ;;  %3521 = vmatpush3.bf16.msra.mxu1 %v3720_v33 }
 0x259   :  { %1647 = vmatprep.subr.bf16.mxu0 %v4401_v21  ;;  %3526 = vmatprep.subr.bf16.mxu1 %v3906_v56 }
 0x2fa   :  { %v1139_v51 = vpop.f32.mrf.mxu0  ;;  %v1180_v54 = vpop.f32.mrf.mxu1 }
 0x2fb   :  { %v1140_v58 = vadd.f32 %v1139_v51, %v4288_v52  ;;  %v1181_v17 = vadd.f32 %v1180_v54, %v4326_v11  ;;  %v3722_v54 = vld [vmem:[%s5241_s3 + $0x98] ss:$12 sps:$4 sm:$0xff]  }
 0x2fc   :  { %v1141_v38 = vpop.f32.mrf.mxu0  ;;  %v3504_v63 = vpop.f32.mrf.mxu1 }
 0x2fd   :  { %v1190_v59 = vadd.f32 %v1140_v58, %v4276_v43  ;;  %v1142_v48 = vadd.f32 %v1141_v38, %v4307_v34 }
 0x2fe   :  { %v1143_v37 = vpop.f32.mrf.mxu0  ;;  %v1183_v29 = vpop.f32.mrf.mxu1 }
 0x2ff   :  { %v3190_v5 = vmul.f32 -1.442695, %v1190_v59  ;;  %v1197_v8 = vadd.f32 %v1142_v48, %v4278_v45  ;;  %v3724_v48 = vld [vmem:[%s5241_s3 + $0x68] ss:$12 sps:$4 sm:$0xff]  }
 0x300   :  { %v1144_v41 = vpop.f32.mrf.mxu0  ;;  %v3505_v4 = vpop.f32.mrf.mxu1 }
 0x301   :  { %3797 = vpow2.f32 %v3190_v5  ;;  %v3191_v14 = vmul.f32 -1.442695, %v1197_v8  ;;  %v3723_v5 = vld [vmem:[%s5241_s3 + $0x80] ss:$12 sps:$4 sm:$0xff]   ;;  %v3725_v41 = vld [vmem:[%s5241_s3 + $0x50] ss:$12 sps:$4 sm:$0xff]  }
 0x302   :  { %v3726_v4 = vld [vmem:[%s5241_s3 + $0x38] ss:$12 sps:$4 sm:$0xff]   ;;  %v3727_v8 = vld [vmem:[%s5241_s3 + $0x20] ss:$12 sps:$4 sm:$0xff]  }
 0x303   :  { %3799 = vpow2.f32 %v3191_v14  ;;  %v3728_v14 = vld [vmem:[%s5241_s3 + $0x8] ss:$12 sps:$4 sm:$0xff]  }
 0x30e   :  { %v3798_v20 = vpop.eup %3797 }
 0x30f   :  { %v1194_v26 = vadd.f32 1.0, %v3798_v20 }
 0x310   :  { %v3800_v32 = vpop.eup %3799 }
 0x311   :  { %3801 = vrcp.f32 %v1194_v26  ;;  %v1201_v42 = vadd.f32 1.0, %v3800_v32 }
 0x313   :  { %3803 = vrcp.f32 %v1201_v42 }
 0x31e   :  { %v3802_v43 = vpop.eup %3801 }
 0x31f   :  { %v1204_v33 = vmul.f32 %v3802_v43, %v1181_v17 }
 0x320   :  { %v3804_v58 = vpop.eup %3803 }
 0x321   :  { %v1205_v51 = vadd.f32 %v1204_v33, %v4311_v40  ;;  %v1207_v38 = vsub.f32 1.0, %v3804_v58  ;;  %v1209_v45 = vmul.f32 %v3804_v58, %v4391_v9  ;;  %v3721_v40 = vld [vmem:[%s5241_s3 + $0xb0] ss:$12 sps:$4 sm:$0xff]  }
 0x323   :  { %3805 = vtanh.f32 %v1205_v51 }
 0x330   :  { %v3806_v63 = vpop.eup %3805 }
 0x331   :  { %v1208_v59 = vmul.f32 %v3806_v63, %v1207_v38 }
 0x333   :  { %v4534_v37 = vadd.f32 %v1209_v45, %v1208_v59 }
 0x335   :  { %v1215_v29 = vpack.c.bf16 %v4534_v37, %v4534_v37 }
 0x337   :  { %1409 = vmatmul.mubr.bf16.vlgmr.msra.gmra.mxu0 %v1215_v29  ;;  %3523 = vmatmul.mubr.bf16.vlgmr.msra.gmra.mxu1 %v1215_v29 }
 0x338   :  { %1648 = vmatpush1.bf16.msra.mxu0 %v4406_v6  ;;  %1679 = vmatprep.mubr.bf16.mxu0 %v3905_v1 }
 0x339   :  { %1649 = vmatprep.subr.bf16.mxu0 %v4416_v10  ;;  %3542 = vmatprep.mubr.msk.bf16.mxu1 %vm3907_vm0, %v3906_v56 }
 0x33a   :  { %3527 = vmatpush3.bf16.msra.mxu1 %v3721_v40 }
 0x33b   :  { %3528 = vmatprep.subr.bf16.mxu1 %v3906_v56 }
 0x33c   :  { %1650 = vmatpush1.bf16.msra.mxu0 %v4422_v12 }
 0x33d   :  { %1651 = vmatprep.subr.bf16.mxu0 %v4432_v16 }
 0x33e   :  { %3529 = vmatpush3.bf16.msra.mxu1 %v3722_v54 }
 0x33f   :  { %3530 = vmatprep.subr.bf16.mxu1 %v3906_v56 }
 0x340   :  { %1652 = vmatpush1.bf16.msra.mxu0 %v4438_v18 }
 0x341   :  { %1653 = vmatprep.subr.bf16.mxu0 %v4448_v22 }
 0x342   :  { %3531 = vmatpush3.bf16.msra.mxu1 %v3723_v5 }
 0x343   :  { %3532 = vmatprep.subr.bf16.mxu1 %v3906_v56 }
 0x344   :  { %1654 = vmatpush1.bf16.msra.mxu0 %v4454_v24 }
 0x345   :  { %1655 = vmatprep.subr.bf16.mxu0 %v4463_v28 }
 0x346   :  { %3533 = vmatpush3.bf16.msra.mxu1 %v3724_v48 }
 0x347   :  { %3534 = vmatprep.subr.bf16.mxu1 %v3906_v56 }
 0x348   :  { %1656 = vmatpush1.bf16.msra.mxu0 %v4469_v30 }
 0x349   :  { %1657 = vmatprep.subr.bf16.mxu0 %v4479_v35 }
 0x34a   :  { %3535 = vmatpush3.bf16.msra.mxu1 %v3725_v41 }
 0x34b   :  { %3536 = vmatprep.subr.bf16.mxu1 %v3906_v56 }
 0x34c   :  { %1658 = vmatpush1.bf16.msra.mxu0 %v4485_v23 }
 0x34d   :  { %1659 = vmatprep.subr.bf16.mxu0 %v4495_v25 }
 0x34e   :  { %3537 = vmatpush3.bf16.msra.mxu1 %v3726_v4 }
 0x34f   :  { %3538 = vmatprep.subr.bf16.mxu1 %v3906_v56 }
 0x350   :  { %1660 = vmatpush1.bf16.msra.mxu0 %v4501_v39 }
 0x351   :  { %1661 = vmatprep.subr.bf16.mxu0 %v4511_v44 }
 0x352   :  { %3539 = vmatpush3.bf16.msra.mxu1 %v3727_v8 }
 0x353   :  { %3540 = vmatprep.subr.bf16.mxu1 %v3906_v56 }
 0x354   :  { %1662 = vmatpush1.bf16.msra.mxu0 %v4517_v46 }
 0x355   :  { %1918 = vmatprep.subr.bf16.mxu0 %v4401_v21 }
 0x356   :  { %3541 = vmatpush3.bf16.msra.mxu1 %v3728_v14 }
 0x357   :  { %3546 = vmatprep.subr.bf16.mxu1 %v3906_v56 }
 0x3f7   :  { %v1410_v20 = vpop.f32.mrf.mxu0  ;;  %v1451_v26 = vpop.f32.mrf.mxu1 }
 0x3f8   :  { %v1411_v32 = vadd.f32 %v1410_v20, %v4288_v52  ;;  %v1452_v41 = vadd.f32 %v1451_v26, %v4326_v11  ;;  %v3730_v26 = vld [vmem:[%s5241_s3 + $0x98] ss:$12 sps:$4 sm:$0xff]  }
 0x3f9   :  { %v1412_v42 = vpop.f32.mrf.mxu0  ;;  %v3524_v17 = vpop.f32.mrf.mxu1 }
 0x3fa   :  { %v1461_v43 = vadd.f32 %v1411_v32, %v4280_v47  ;;  %v1413_v38 = vadd.f32 %v1412_v42, %v4307_v34 }
 0x3fb   :  { %v1414_v33 = vpop.f32.mrf.mxu0  ;;  %v1454_v51 = vpop.f32.mrf.mxu1 }
 0x3fc   :  { %v3216_v58 = vmul.f32 -1.442695, %v1461_v43  ;;  %v1468_v45 = vadd.f32 %v1413_v38, %v4285_v50  ;;  %v3731_v33 = vld [vmem:[%s5241_s3 + $0x80] ss:$12 sps:$4 sm:$0xff]   ;;  %v3732_v51 = vld [vmem:[%s5241_s3 + $0x68] ss:$12 sps:$4 sm:$0xff]  }
 0x3fd   :  { %v1415_v63 = vpop.f32.mrf.mxu0  ;;  %v3525_v59 = vpop.f32.mrf.mxu1  ;;  %v3734_v38 = vld [vmem:[%s5241_s3 + $0x38] ss:$12 sps:$4 sm:$0xff]  }
 0x3fe   :  { %3807 = vpow2.f32 %v3216_v58  ;;  %v3217_v29 = vmul.f32 -1.442695, %v1468_v45  ;;  %v3733_v58 = vld [vmem:[%s5241_s3 + $0x50] ss:$12 sps:$4 sm:$0xff]   ;;  %v3735_v63 = vld [vmem:[%s5241_s3 + $0x20] ss:$12 sps:$4 sm:$0xff]  }
 0x3ff   :  { %v3736_v59 = vld [vmem:[%s5241_s3 + $0x8] ss:$12 sps:$4 sm:$0xff]  }
 0x400   :  { %3809 = vpow2.f32 %v3217_v29 }
 0x40b   :  { %v3808_v40 = vpop.eup %3807 }
 0x40c   :  { %v1465_v54 = vadd.f32 1.0, %v3808_v40 }
 0x40d   :  { %v3810_v5 = vpop.eup %3809 }
 0x40e   :  { %3811 = vrcp.f32 %v1465_v54  ;;  %v1472_v48 = vadd.f32 1.0, %v3810_v5 }
 0x410   :  { %3813 = vrcp.f32 %v1472_v48 }
 0x41b   :  { %v3812_v47 = vpop.eup %3811 }
 0x41c   :  { %v1475_v4 = vmul.f32 %v3812_v47, %v1452_v41 }
 0x41d   :  { %v3814_v14 = vpop.eup %3813 }
 0x41e   :  { %v1476_v8 = vadd.f32 %v1475_v4, %v4314_v49  ;;  %v1478_v20 = vsub.f32 1.0, %v3814_v14  ;;  %v1480_v50 = vmul.f32 %v3814_v14, %v4534_v37  ;;  %v3729_v49 = vld [vmem:[%s5241_s3 + $0xb0] ss:$12 sps:$4 sm:$0xff]  }
 0x420   :  { %3815 = vtanh.f32 %v1476_v8 }
 0x42d   :  { %v3816_v32 = vpop.eup %3815 }
 0x42e   :  { %v1479_v42 = vmul.f32 %v3816_v32, %v1478_v20 }
 0x430   :  { %v4596_v17 = vadd.f32 %v1480_v50, %v1479_v42 }
 0x432   :  { %v1486_v43 = vpack.c.bf16 %v4596_v17, %v4596_v17 }
 0x434   :  { %1680 = vmatmul.mubr.bf16.vlgmr.msra.gmra.mxu0 %v1486_v43  ;;  %3543 = vmatmul.mubr.bf16.vlgmr.msra.gmra.mxu1 %v1486_v43 }
 0x435   :  { %1919 = vmatpush1.bf16.msra.mxu0 %v4406_v6  ;;  %1950 = vmatprep.mubr.bf16.mxu0 %v3905_v1 }
 0x436   :  { %1920 = vmatprep.subr.bf16.mxu0 %v4416_v10  ;;  %3562 = vmatprep.mubr.msk.bf16.mxu1 %vm3907_vm0, %v3906_v56 }
 0x437   :  { %3547 = vmatpush3.bf16.msra.mxu1 %v3729_v49 }
 0x438   :  { %3548 = vmatprep.subr.bf16.mxu1 %v3906_v56 }
 0x439   :  { %1921 = vmatpush1.bf16.msra.mxu0 %v4422_v12 }
 0x43a   :  { %1922 = vmatprep.subr.bf16.mxu0 %v4432_v16 }
 0x43b   :  { %3549 = vmatpush3.bf16.msra.mxu1 %v3730_v26 }
 0x43c   :  { %3550 = vmatprep.subr.bf16.mxu1 %v3906_v56 }
 0x43d   :  { %1923 = vmatpush1.bf16.msra.mxu0 %v4438_v18 }
 0x43e   :  { %1924 = vmatprep.subr.bf16.mxu0 %v4448_v22 }
 0x43f   :  { %3551 = vmatpush3.bf16.msra.mxu1 %v3731_v33 }
 0x440   :  { %3552 = vmatprep.subr.bf16.mxu1 %v3906_v56 }
 0x441   :  { %1925 = vmatpush1.bf16.msra.mxu0 %v4454_v24 }
 0x442   :  { %1926 = vmatprep.subr.bf16.mxu0 %v4463_v28 }
 0x443   :  { %3553 = vmatpush3.bf16.msra.mxu1 %v3732_v51 }
 0x444   :  { %3554 = vmatprep.subr.bf16.mxu1 %v3906_v56 }
 0x445   :  { %1927 = vmatpush1.bf16.msra.mxu0 %v4469_v30 }
 0x446   :  { %1928 = vmatprep.subr.bf16.mxu0 %v4479_v35 }
 0x447   :  { %3555 = vmatpush3.bf16.msra.mxu1 %v3733_v58 }
 0x448   :  { %3556 = vmatprep.subr.bf16.mxu1 %v3906_v56 }
 0x449   :  { %1929 = vmatpush1.bf16.msra.mxu0 %v4485_v23 }
 0x44a   :  { %1930 = vmatprep.subr.bf16.mxu0 %v4495_v25 }
 0x44b   :  { %3557 = vmatpush3.bf16.msra.mxu1 %v3734_v38 }
 0x44c   :  { %3558 = vmatprep.subr.bf16.mxu1 %v3906_v56 }
 0x44d   :  { %1931 = vmatpush1.bf16.msra.mxu0 %v4501_v39 }
 0x44e   :  { %1932 = vmatprep.subr.bf16.mxu0 %v4511_v44 }
 0x44f   :  { %3559 = vmatpush3.bf16.msra.mxu1 %v3735_v63 }
 0x450   :  { %3560 = vmatprep.subr.bf16.mxu1 %v3906_v56 }
 0x451   :  { %1933 = vmatpush1.bf16.msra.mxu0 %v4517_v46 }
 0x452   :  { %2189 = vmatprep.subr.bf16.mxu0 %v4401_v21 }
 0x453   :  { %3561 = vmatpush3.bf16.msra.mxu1 %v3736_v59 }
 0x454   :  { %3566 = vmatprep.subr.bf16.mxu1 %v3906_v56 }
 0x4f4   :  { %v1681_v45 = vpop.f32.mrf.mxu0  ;;  %v1722_v29 = vpop.f32.mrf.mxu1 }
 0x4f5   :  { %v1682_v40 = vadd.f32 %v1681_v45, %v4288_v52  ;;  %v1723_v33 = vadd.f32 %v1722_v29, %v4326_v11  ;;  %v3738_v29 = vld [vmem:[%s5241_s3 + $0x98] ss:$12 sps:$4 sm:$0xff]  }
 0x4f6   :  { %v1683_v54 = vpop.f32.mrf.mxu0  ;;  %v3544_v5 = vpop.f32.mrf.mxu1 }
 0x4f7   :  { %v1732_v48 = vadd.f32 %v1682_v40, %v4290_v53  ;;  %v1684_v8 = vadd.f32 %v1683_v54, %v4307_v34  ;;  %v3739_v5 = vld [vmem:[%s5241_s3 + $0x80] ss:$12 sps:$4 sm:$0xff]  }
 0x4f8   :  { %v1685_v41 = vpop.f32.mrf.mxu0  ;;  %v1725_v47 = vpop.f32.mrf.mxu1 }
 0x4f9   :  { %v3242_v4 = vmul.f32 -1.442695, %v1732_v48  ;;  %v1739_v32 = vadd.f32 %v1684_v8, %v4292_v55  ;;  %v3741_v48 = vld [vmem:[%s5241_s3 + $0x50] ss:$12 sps:$4 sm:$0xff]   ;;  %v3742_v41 = vld [vmem:[%s5241_s3 + $0x38] ss:$12 sps:$4 sm:$0xff]  }
 0x4fa   :  { %v1686_v14 = vpop.f32.mrf.mxu0  ;;  %v3545_v20 = vpop.f32.mrf.mxu1  ;;  %v3743_v47 = vld [vmem:[%s5241_s3 + $0x20] ss:$12 sps:$4 sm:$0xff]  }
 0x4fb   :  { %3817 = vpow2.f32 %v3242_v4  ;;  %v3243_v42 = vmul.f32 -1.442695, %v1739_v32  ;;  %v3744_v4 = vld [vmem:[%s5241_s3 + $0x8] ss:$12 sps:$4 sm:$0xff]  }
 0x4fd   :  { %3819 = vpow2.f32 %v3243_v42 }
 0x508   :  { %v3818_v50 = vpop.eup %3817 }
 0x509   :  { %v1736_v43 = vadd.f32 1.0, %v3818_v50 }
 0x50a   :  { %v3820_v49 = vpop.eup %3819 }
 0x50b   :  { %3821 = vrcp.f32 %v1736_v43  ;;  %v1743_v26 = vadd.f32 1.0, %v3820_v49 }
 0x50d   :  { %3823 = vrcp.f32 %v1743_v26 }
 0x518   :  { %v3822_v53 = vpop.eup %3821 }
 0x519   :  { %v1746_v51 = vmul.f32 %v3822_v53, %v1723_v33 }
 0x51a   :  { %v3824_v38 = vpop.eup %3823 }
 0x51b   :  { %v1747_v58 = vadd.f32 %v1746_v51, %v4320_v61  ;;  %v1749_v63 = vsub.f32 1.0, %v3824_v38  ;;  %v1751_v55 = vmul.f32 %v3824_v38, %v4596_v17  ;;  %v3737_v61 = vld [vmem:[%s5241_s3 + $0xb0] ss:$12 sps:$4 sm:$0xff]  }
 0x51d   :  { %3825 = vtanh.f32 %v1747_v58 }
 0x52a   :  { %v3826_v59 = vpop.eup %3825 }
 0x52b   :  { %v1750_v45 = vmul.f32 %v3826_v59, %v1749_v63 }
 0x52d   :  { %v4658_v40 = vadd.f32 %v1751_v55, %v1750_v45 }
 0x52f   :  { %v1757_v54 = vpack.c.bf16 %v4658_v40, %v4658_v40 }
 0x531   :  { %1951 = vmatmul.mubr.bf16.vlgmr.msra.gmra.mxu0 %v1757_v54  ;;  %3563 = vmatmul.mubr.bf16.vlgmr.msra.gmra.mxu1 %v1757_v54 }
 0x532   :  { %2190 = vmatpush1.bf16.msra.mxu0 %v4406_v6  ;;  %2221 = vmatprep.mubr.bf16.mxu0 %v3905_v1 }
 0x533   :  { %2191 = vmatprep.subr.bf16.mxu0 %v4416_v10  ;;  %3582 = vmatprep.mubr.msk.bf16.mxu1 %vm3907_vm0, %v3906_v56 }
 0x534   :  { %3567 = vmatpush3.bf16.msra.mxu1 %v3737_v61 }
 0x535   :  { %3568 = vmatprep.subr.bf16.mxu1 %v3906_v56 }
 0x536   :  { %2192 = vmatpush1.bf16.msra.mxu0 %v4422_v12 }
 0x537   :  { %2193 = vmatprep.subr.bf16.mxu0 %v4432_v16 }
 0x538   :  { %3569 = vmatpush3.bf16.msra.mxu1 %v3738_v29 }
 0x539   :  { %3570 = vmatprep.subr.bf16.mxu1 %v3906_v56 }
 0x53a   :  { %2194 = vmatpush1.bf16.msra.mxu0 %v4438_v18 }
 0x53b   :  { %2195 = vmatprep.subr.bf16.mxu0 %v4448_v22 }
 0x53c   :  { %3571 = vmatpush3.bf16.msra.mxu1 %v3739_v5 }
 0x53d   :  { %3572 = vmatprep.subr.bf16.mxu1 %v3906_v56 }
 0x53e   :  { %2196 = vmatpush1.bf16.msra.mxu0 %v4454_v24 }
 0x53f   :  { %2197 = vmatprep.subr.bf16.mxu0 %v4463_v28 }
 0x542   :  { %2198 = vmatpush1.bf16.msra.mxu0 %v4469_v30 }
 0x543   :  { %2199 = vmatprep.subr.bf16.mxu0 %v4479_v35 }
 0x546   :  { %2200 = vmatpush1.bf16.msra.mxu0 %v4485_v23 }
 0x547   :  { %2201 = vmatprep.subr.bf16.mxu0 %v4495_v25 }
 0x54a   :  { %2202 = vmatpush1.bf16.msra.mxu0 %v4501_v39 }
 0x54b   :  { %2203 = vmatprep.subr.bf16.mxu0 %v4511_v44 }
 0x54e   :  { %2204 = vmatpush1.bf16.msra.mxu0 %v4517_v46 }
 0x54f   :  { %2460 = vmatprep.subr.bf16.mxu0 %v4401_v21  ;;  %v3740_v21 = vld [vmem:[%s5241_s3 + $0x68] ss:$12 sps:$4 sm:$0xff]  }
 0x550   :  { %3573 = vmatpush3.bf16.msra.mxu1 %v3740_v21 }
 0x551   :  { %3574 = vmatprep.subr.bf16.mxu1 %v3906_v56 }
 0x554   :  { %3575 = vmatpush3.bf16.msra.mxu1 %v3741_v48 }
 0x555   :  { %3576 = vmatprep.subr.bf16.mxu1 %v3906_v56 }
 0x558   :  { %3577 = vmatpush3.bf16.msra.mxu1 %v3742_v41 }
 0x559   :  { %3578 = vmatprep.subr.bf16.mxu1 %v3906_v56 }
 0x55c   :  { %3579 = vmatpush3.bf16.msra.mxu1 %v3743_v47 }
 0x55d   :  { %3580 = vmatprep.subr.bf16.mxu1 %v3906_v56 }
 0x560   :  { %3581 = vmatpush3.bf16.msra.mxu1 %v3744_v4 }
 0x561   :  { %3586 = vmatprep.subr.bf16.mxu1 %v3906_v56 }
 0x5f1   :  { %v1952_v8 = vpop.f32.mrf.mxu0  ;;  %v1993_v14 = vpop.f32.mrf.mxu1 }
 0x5f2   :  { %v1953_v20 = vadd.f32 %v1952_v8, %v4288_v52  ;;  %v1994_v54 = vadd.f32 %v1993_v14, %v4326_v11 }
 0x5f3   :  { %v1954_v32 = vpop.f32.mrf.mxu0  ;;  %v3564_v42 = vpop.f32.mrf.mxu1 }
 0x5f4   :  { %v2003_v50 = vadd.f32 %v1953_v20, %v4295_v60  ;;  %v1955_v33 = vadd.f32 %v1954_v32, %v4307_v34 }
 0x5f5   :  { %v1956_v43 = vpop.f32.mrf.mxu0  ;;  %v1996_v49 = vpop.f32.mrf.mxu1 }
 0x5f6   :  { %v3268_v26 = vmul.f32 -1.442695, %v2003_v50  ;;  %v2010_v58 = vadd.f32 %v1955_v33, %v4297_v62 }
 0x5f7   :  { %v1957_v53 = vpop.f32.mrf.mxu0  ;;  %v3565_v51 = vpop.f32.mrf.mxu1 }
 0x5f8   :  { %3827 = vpow2.f32 %v3268_v26  ;;  %v3269_v38 = vmul.f32 -1.442695, %v2010_v58 }
 0x5fa   :  { %3829 = vpow2.f32 %v3269_v38 }
 0x605   :  { %v3828_v63 = vpop.eup %3827 }
 0x606   :  { %v2007_v59 = vadd.f32 1.0, %v3828_v63 }
 0x607   :  { %v3830_v45 = vpop.eup %3829 }
 0x608   :  { %3831 = vrcp.f32 %v2007_v59  ;;  %v2014_v55 = vadd.f32 1.0, %v3830_v45 }
 0x60a   :  { %3833 = vrcp.f32 %v2014_v55 }
 0x615   :  { %v3832_v60 = vpop.eup %3831 }
 0x616   :  { %v2017_v61 = vmul.f32 %v3832_v60, %v1994_v54  ;;  %v3753_v54 = vld [vmem:[%s5246_s6 + $0x70] ss:$8 sps:$4 sm:$0xff]  }
 0x617   :  { %v3834_v5 = vpop.eup %3833 }
 0x618   :  { %v2018_v29 = vadd.f32 %v2017_v61, %v4324_v31  ;;  %v2020_v21 = vsub.f32 1.0, %v3834_v5  ;;  %v2022_v62 = vmul.f32 %v3834_v5, %v4658_v40  ;;  %v3745_v31 = vld [vmem:[%s5241_s3 + $0xb0] ss:$12 sps:$4 sm:$0xff]   ;;  %v3756_v61 = vld [vmem:[%s5246_s6 + $0x60] ss:$8 sps:$4 sm:$0xff]  }
 0x619   :  { %v3759_v5 = vld [vmem:[%s5246_s6 + $0x50] ss:$8 sps:$4 sm:$0xff]  }
 0x61a   :  { %3835 = vtanh.f32 %v2018_v29  ;;  %v3761_v29 = vld [vmem:[%s5246_s6 + $0x54] ss:$8 sps:$4 sm:$0xff]  }
 0x627   :  { %v3836_v48 = vpop.eup %3835 }
 0x628   :  { %v2021_v41 = vmul.f32 %v3836_v48, %v2020_v21  ;;  %v3764_v21 = vld [vmem:[%s5246_s6 + $0x44] ss:$8 sps:$4 sm:$0xff]   ;;  %v3762_v48 = vld [vmem:[%s5246_s6 + $0x40] ss:$8 sps:$4 sm:$0xff]  }
 0x62a   :  { %v4720_v47 = vadd.f32 %v2022_v62, %v2021_v41  ;;  %v3767_v41 = vld [vmem:[%s5246_s6 + $0x34] ss:$8 sps:$4 sm:$0xff]   ;;  %v3765_v62 = vld [vmem:[%s5246_s6 + $0x30] ss:$8 sps:$4 sm:$0xff]  }
 0x62c   :  { %v2028_v4 = vpack.c.bf16 %v4720_v47, %v4720_v47 }
 0x62e   :  { %2222 = vmatmul.mubr.bf16.vlgmr.msra.gmra.mxu0 %v2028_v4  ;;  %3583 = vmatmul.mubr.bf16.vlgmr.msra.gmra.mxu1 %v2028_v4  ;;  %v3770_v4 = vld [vmem:[%s5246_s6 + $0x24] ss:$8 sps:$4 sm:$0xff]  }
 0x62f   :  { %2461 = vmatpush1.bf16.msra.mxu0 %v4406_v6  ;;  %2492 = vmatprep.mubr.bf16.mxu0 %v3905_v1  ;;  %v3746_v6 = vld [vmem:[%s5241_s3 + $0x98] ss:$12 sps:$4 sm:$0xff]  }
 0x630   :  { %2462 = vmatprep.subr.bf16.mxu0 %v4416_v10  ;;  %3602 = vmatprep.mubr.msk.bf16.mxu1 %vm3907_vm0, %v3906_v56  ;;  %v3747_v10 = vld [vmem:[%s5241_s3 + $0x80] ss:$12 sps:$4 sm:$0xff]  }
 0x631   :  { %3587 = vmatpush3.bf16.msra.mxu1 %v3745_v31  ;;  %v3768_v31 = vld [vmem:[%s5246_s6 + $0x20] ss:$8 sps:$4 sm:$0xff]  }
 0x632   :  { %3588 = vmatprep.subr.bf16.mxu1 %v3906_v56 }
 0x633   :  { %2463 = vmatpush1.bf16.msra.mxu0 %v4422_v12  ;;  %v3748_v12 = vld [vmem:[%s5241_s3 + $0x68] ss:$12 sps:$4 sm:$0xff]  }
 0x634   :  { %2464 = vmatprep.subr.bf16.mxu0 %v4432_v16  ;;  %v3749_v16 = vld [vmem:[%s5241_s3 + $0x50] ss:$12 sps:$4 sm:$0xff]  }
 0x635   :  { %3589 = vmatpush3.bf16.msra.mxu1 %v3746_v6  ;;  %v3773_v6 = vld [vmem:[%s5246_s6 + $0x14] ss:$8 sps:$4 sm:$0xff]  }
 0x636   :  { %3590 = vmatprep.subr.bf16.mxu1 %v3906_v56 }
 0x637   :  { %2465 = vmatpush1.bf16.msra.mxu0 %v4438_v18  ;;  %v3755_v18 = vld [vmem:[%s5246_s6 + $0x74] ss:$8 sps:$4 sm:$0xff]  }
 0x638   :  { %2466 = vmatprep.subr.bf16.mxu0 %v4448_v22  ;;  %v3750_v22 = vld [vmem:[%s5241_s3 + $0x38] ss:$12 sps:$4 sm:$0xff]  }
 0x639   :  { %3591 = vmatpush3.bf16.msra.mxu1 %v3747_v10  ;;  %v3771_v10 = vld [vmem:[%s5246_s6 + $0x10] ss:$8 sps:$4 sm:$0xff]  }
 0x63a   :  { %3592 = vmatprep.subr.bf16.mxu1 %v3906_v56 }
 0x63b   :  { %2467 = vmatpush1.bf16.msra.mxu0 %v4454_v24  ;;  %v3751_v24 = vld [vmem:[%s5241_s3 + $0x20] ss:$12 sps:$4 sm:$0xff]  }
 0x63c   :  { %2468 = vmatprep.subr.bf16.mxu0 %v4463_v28  ;;  %v3752_v28 = vld [vmem:[%s5241_s3 + $0x8] ss:$12 sps:$4 sm:$0xff]  }
 0x63d   :  { %3593 = vmatpush3.bf16.msra.mxu1 %v3748_v12  ;;  %v3776_v12 = vld [vmem:[%s5246_s6 + $0x4] ss:$8 sps:$4 sm:$0xff]  }
 0x63e   :  { %3594 = vmatprep.subr.bf16.mxu1 %v3906_v56 }
 0x63f   :  { %2469 = vmatpush1.bf16.msra.mxu0 %v4469_v30 }
 0x640   :  { %2470 = vmatprep.subr.bf16.mxu0 %v4479_v35 }
 0x641   :  { %3595 = vmatpush3.bf16.msra.mxu1 %v3749_v16  ;;  %v3774_v16 = vld [vmem:[%s5246_s6] ss:$8 sps:$4 sm:$0xff]  }
 0x642   :  { %3596 = vmatprep.subr.bf16.mxu1 %v3906_v56 }
 0x643   :  { %2471 = vmatpush1.bf16.msra.mxu0 %v4485_v23 }
 0x644   :  { %2472 = vmatprep.subr.bf16.mxu0 %v4495_v25 }
 0x645   :  { %3597 = vmatpush3.bf16.msra.mxu1 %v3750_v22  ;;  %v2578_v22 = vpack.c.bf16 %v4596_v17, %v4534_v37 }
 0x646   :  { %3598 = vmatprep.subr.bf16.mxu1 %v3906_v56 }
 0x647   :  { %2473 = vmatpush1.bf16.msra.mxu0 %v4501_v39 }
 0x648   :  { %2474 = vmatprep.subr.bf16.mxu0 %v4511_v44 }
 0x649   :  { %3599 = vmatpush3.bf16.msra.mxu1 %v3751_v24  ;;  %v2579_v24 = vpack.c.bf16 %v4720_v47, %v4658_v40 }
 0x64a   :  { %3600 = vmatprep.subr.bf16.mxu1 %v3906_v56 }
 0x64b   :  { %2475 = vmatpush1.bf16.msra.mxu0 %v4517_v46 }
 0x64c   :  { %2689 = vmatprep.subr.bf16.mxu0 %v3755_v18  ;;  %v2577_v18 = vpack.c.bf16 %v4391_v9, %v4330_v3 }
 0x64d   :  { %3601 = vmatpush3.bf16.msra.mxu1 %v3752_v28 }
 0x6ee   :  { %v2223_v30 = vpop.f32.mrf.mxu0  ;;  %v2264_v35 = vpop.f32.mrf.mxu1 }
 0x6ef   :  { %v2224_v23 = vadd.f32 %v2223_v30, %v4288_v52  ;;  %v2265_v53 = vadd.f32 %v2264_v35, %v4326_v11 }
 0x6f0   :  { %v2225_v25 = vpop.f32.mrf.mxu0  ;;  %v3584_v39 = vpop.f32.mrf.mxu1 }
 0x6f1   :  { %v2274_v44 = vadd.f32 %v2224_v23, %v4299_v2  ;;  %v2226_v20 = vadd.f32 %v2225_v25, %v4307_v34 }
 0x6f2   :  { %v2227_v46 = vpop.f32.mrf.mxu0  ;;  %v2267_v8 = vpop.f32.mrf.mxu1 }
 0x6f3   :  { %v3294_v14 = vmul.f32 -1.442695, %v2274_v44  ;;  %v2281_v50 = vadd.f32 %v2226_v20, %v4302_v7 }
 0x6f4   :  { %v2228_v32 = vpop.f32.mrf.mxu0  ;;  %v3585_v42 = vpop.f32.mrf.mxu1 }
 0x6f5   :  { %3837 = vpow2.f32 %v3294_v14  ;;  %v3295_v56 = vmul.f32 -1.442695, %v2281_v50 }
 0x6f7   :  { %3839 = vpow2.f32 %v3295_v56 }
 0x702   :  { %v3838_v43 = vpop.eup %3837 }
 0x703   :  { %v2278_v49 = vadd.f32 1.0, %v3838_v43 }
 0x704   :  { %v3840_v26 = vpop.eup %3839 }
 0x705   :  { %3841 = vrcp.f32 %v2278_v49  ;;  %v2285_v33 = vadd.f32 1.0, %v3840_v26 }
 0x707   :  { %3843 = vrcp.f32 %v2285_v33 }
 0x712   :  { %v3842_v2 = vpop.eup %3841 }
 0x713   :  { %v2288_v51 = vmul.f32 %v3842_v2, %v2265_v53 }
 0x714   :  { %v3844_v38 = vpop.eup %3843 }
 0x715   :  { %v2289_v58 = vadd.f32 %v2288_v51, %v4318_v57  ;;  %v2291_v63 = vsub.f32 1.0, %v3844_v38  ;;  %v2293_v7 = vmul.f32 %v3844_v38, %v4720_v47  ;;  %v3758_v57 = vld [vmem:[%s5246_s6 + $0x64] ss:$8 sps:$4 sm:$0xff]  }
 0x717   :  { %3845 = vtanh.f32 %v2289_v58 }
 0x724   :  { %v3846_v59 = vpop.eup %3845 }
 0x725   :  { %v2292_v45 = vmul.f32 %v3846_v59, %v2291_v63 }
 0x727   :  { %v4783_v55 = vadd.f32 %v2293_v7, %v2292_v45 }
 0x729   :  { %v2299_v60 = vpack.c.bf16 %v4783_v55, %v4783_v55 }
 0x72b   :  { %2493 = vmatmul.mubr.bf16.vlgmr.msra.gmra.mxu0 %v2299_v60  ;;  %3603 = vmatmul.mubr.bf16.vlgmr.msra.gmra.mxu1 %v2299_v60 }
 0x72c   :  { %2690 = vmatpush1.bf16.msra.mxu0 %v3753_v54  ;;  %2721 = vmatprep.mubr.bf16.mxu0 %v3905_v1 }
 0x72d   :  { %2691 = vmatprep.subr.bf16.mxu0 %v3758_v57 }
 0x730   :  { %2692 = vmatpush1.bf16.msra.mxu0 %v3756_v61 }
 0x731   :  { %2693 = vmatprep.subr.bf16.mxu0 %v3761_v29 }
 0x734   :  { %2694 = vmatpush1.bf16.msra.mxu0 %v3759_v5 }
 0x735   :  { %2695 = vmatprep.subr.bf16.mxu0 %v3764_v21 }
 0x738   :  { %2696 = vmatpush1.bf16.msra.mxu0 %v3762_v48 }
 0x739   :  { %2697 = vmatprep.subr.bf16.mxu0 %v3767_v41 }
 0x73c   :  { %2698 = vmatpush1.bf16.msra.mxu0 %v3765_v62 }
 0x73d   :  { %2699 = vmatprep.subr.bf16.mxu0 %v3770_v4 }
 0x740   :  { %2700 = vmatpush1.bf16.msra.mxu0 %v3768_v31 }
 0x741   :  { %2701 = vmatprep.subr.bf16.mxu0 %v3773_v6 }
 0x744   :  { %2702 = vmatpush1.bf16.msra.mxu0 %v3771_v10 }
 0x745   :  { %2703 = vmatprep.subr.bf16.mxu0 %v3776_v12 }
 0x748   :  { %2704 = vmatpush1.bf16.msra.mxu0 %v3774_v16 }
 0x74b   :  { %2722 = vmatmul.mubr.bf16.vlgmr.msra.gmra.mxu0 %v2577_v18 }
 0x74c   :  { %2731 = vmatprep.mubr.bf16.mxu0 %v3905_v1 }
 0x753   :  { %2732 = vmatmul.mubr.bf16.gmra.mxu0 %v2578_v22 }
 0x754   :  { %2741 = vmatprep.mubr.bf16.mxu0 %v3905_v1 }
 0x75b   :  { %2742 = vmatmul.mubr.bf16.gmra.mxu0 %v2579_v24 }
 0x75c   :  { %2751 = vmatprep.mubr.bf16.mxu0 %v3905_v1 }
 0x7eb   :  { %v2494_v28 = vpop.f32.mrf.mxu0  ;;  %v2535_v30 = vpop.f32.mrf.mxu1 }
 0x7ec   :  { %v2495_v35 = vadd.f32 %v2494_v28, %v4288_v52  ;;  %v2597_v52 = vld [vmem:[%s5247_s7] sm:$0x3]  ;;  %v2536_v50 = vadd.f32 %v2535_v30, %v4326_v11  ;;  %v4956_v28 = vand.u32 127, %v79_v15 }
 0x7ed   :  { %v2496_v3 = vpop.f32.mrf.mxu0  ;;  %v3604_v9 = vpop.f32.mrf.mxu1 }
 0x7ee   :  { %v2545_v23 = vadd.f32 %v2495_v35, %v4304_v13  ;;  %v2497_v17 = vadd.f32 %v2496_v3, %v4307_v34  ;;  %v4850_v13 = vrot.slane %v2597_v52, %v4262_v19  ;;  %v4853_v34 = vrot.slane %v2597_v52, %v4268_v27 }
 0x7ef   :  { %v2498_v25 = vpop.f32.mrf.mxu0  ;;  %v2538_v39 = vpop.f32.mrf.mxu1  ;;  %v4961_v35 = vadd.s32 128, %v4956_v28 }
 0x7f0   :  { %v3320_v37 = vmul.f32 -1.442695, %v2545_v23  ;;  %v2552_v40 = vadd.f32 %v2497_v17, %v4309_v36 }
 0x7f1   :  { %v2499_v44 = vpop.f32.mrf.mxu0  ;;  %v3605_v46 = vpop.f32.mrf.mxu1 }
 0x7f2   :  { %3847 = vpow2.f32 %v3320_v37  ;;  %v3321_v47 = vmul.f32 -1.442695, %v2552_v40 }
 0x7f4   :  { %3849 = vpow2.f32 %v3321_v47 }
 0x7ff   :  { %v3848_v1 = vpop.eup %3847 }
 0x800   :  { %v2549_v8 = vadd.f32 1.0, %v3848_v1 }
 0x801   :  { %v3850_v14 = vpop.eup %3849 }
 0x802   :  { %3851 = vrcp.f32 %v2549_v8  ;;  %v2556_v32 = vadd.f32 1.0, %v3850_v14 }
 0x804   :  { %3853 = vrcp.f32 %v2556_v32 }
 0x80b   :  { %v2723_v20 = vpop.f32.mrf.mxu0 }
 0x80c   :  { %v4856_v36 = vadd.f32 %v2723_v20, %v4850_v13 }
 0x80d   :  { %v2725_v42 = vpop.f32.mrf.mxu0 }
 0x80e   :  { %2762 = vst [vmem:[%s5248_s8] sm:$0xff] %v4856_v36  ;;  %v4864_v19 = vadd.f32 %v2725_v42, %v4853_v34 }
 0x80f   :  { %v3852_v56 = vpop.eup %3851  ;;  %v2727_v43 = vpop.f32.mrf.mxu0 }
 0x810   :  { %v2559_v27 = vmul.f32 %v3852_v56, %v2536_v50  ;;  %2763 = vst [vmem:[%s5248_s8 + $0x8] sm:$0xff] %v4864_v19  ;;  %v4871_v49 = vadd.f32 %v2727_v43, %v4850_v13  ;;  %v2778_v11 = vmax.f32 %v4856_v36, %v4864_v19 }
 0x811   :  { %v2729_v26 = vpop.f32.mrf.mxu0  ;;  %v3854_v29 = vpop.eup %3853 }
 0x812   :  { %v2560_v33 = vadd.f32 %v2559_v27, %v4322_v0  ;;  %2764 = vst [vmem:[%s5248_s8 + $0x10] sm:$0xff] %v4871_v49  ;;  %v4881_v53 = vadd.f32 %v2729_v26, %v4853_v34  ;;  %2779 = vmax.xlane.f32.xlu0 %v2778_v11  ;;  %v2562_v4 = vsub.f32 1.0, %v3854_v29  ;;  %v2564_v16 = vmul.f32 %v3854_v29, %v4783_v55 }
 0x813   :  { %v2733_v2 = vpop.f32.mrf.mxu0 }
 0x814   :  { %3855 = vtanh.f32 %v2560_v33  ;;  %2765 = vst [vmem:[%s5248_s8 + $0x18] sm:$0xff] %v4881_v53  ;;  %v4888_v51 = vadd.f32 %v2733_v2, %v4850_v13  ;;  %v2781_v0 = vmax.f32 %v4871_v49, %v4881_v53 }
 0x815   :  { %v2735_v58 = vpop.f32.mrf.mxu0 }
 0x816   :  { %2766 = vst [vmem:[%s5248_s8 + $0x20] sm:$0xff] %v4888_v51  ;;  %v4897_v38 = vadd.f32 %v2735_v58, %v4853_v34  ;;  %2782 = vmax.xlane.f32.xlu0 %v2781_v0 }
 0x817   :  { %v2737_v63 = vpop.f32.mrf.mxu0 }
 0x818   :  { %2767 = vst [vmem:[%s5248_s8 + $0x28] sm:$0xff] %v4897_v38  ;;  %v4904_v59 = vadd.f32 %v2737_v63, %v4850_v13  ;;  %v2784_v45 = vmax.f32 %v4888_v51, %v4897_v38 }
 0x819   :  { %v2739_v7 = vpop.f32.mrf.mxu0 }
 0x81a   :  { %2768 = vst [vmem:[%s5248_s8 + $0x30] sm:$0xff] %v4904_v59  ;;  %v4913_v54 = vadd.f32 %v2739_v7, %v4853_v34  ;;  %2785 = vmax.xlane.f32.xlu1 %v2784_v45 }
 0x81b   :  { %v2743_v60 = vpop.f32.mrf.mxu0 }
 0x81c   :  { %2769 = vst [vmem:[%s5248_s8 + $0x38] sm:$0xff] %v4913_v54  ;;  %v4920_v57 = vadd.f32 %v2743_v60, %v4850_v13  ;;  %v2787_v61 = vmax.f32 %v4904_v59, %v4913_v54 }
 0x81d   :  { %v2745_v5 = vpop.f32.mrf.mxu0 }
 0x81e   :  { %2770 = vst [vmem:[%s5248_s8 + $0x40] sm:$0xff] %v4920_v57  ;;  %v4929_v21 = vadd.f32 %v2745_v5, %v4853_v34  ;;  %2788 = vmax.xlane.f32.xlu1 %v2787_v61 }
 0x81f   :  { %v2747_v48 = vpop.f32.mrf.mxu0 }
 0x820   :  { %2771 = vst [vmem:[%s5248_s8 + $0x48] sm:$0xff] %v4929_v21  ;;  %v4936_v41 = vadd.f32 %v2747_v48, %v4850_v13  ;;  %v2790_v62 = vmax.f32 %v4920_v57, %v4929_v21 }
 0x821   :  { %v3856_v31 = vpop.eup %3855  ;;  %v2749_v6 = vpop.f32.mrf.mxu0 }
 0x822   :  { %2772 = vst [vmem:[%s5248_s8 + $0x50] sm:$0xff] %v4936_v41  ;;  %v4945_v10 = vadd.f32 %v2749_v6, %v4853_v34  ;;  %2791 = vmax.xlane.f32.xlu0 %v2790_v62  ;;  %v2563_v12 = vmul.f32 %v3856_v31, %v2562_v4 }
 0x824   :  { %2773 = vst [vmem:[%s5248_s8 + $0x58] sm:$0xff] %v4945_v10  ;;  %v2793_v18 = vmax.f32 %v4936_v41, %v4945_v10  ;;  %v2565_v22 = vadd.f32 %v2564_v16, %v2563_v12 }
 0x826   :  { %2794 = vmax.xlane.f32.xlu1 %v2793_v18  ;;  %v2580_v24 = vpack.c.bf16 %v2565_v22, %v4783_v55 }
 0x828   :  { %2752 = vmatmul.mubr.bf16.gmra.mxu0 %v2580_v24 }
 0x89b   :  { %v4958_v30 = vpop.xlane.xlu0 %2779 }
 0x89c   :  { %vm2910_vm1 = vcmp.ge.f32.partialorder %v4856_v36, %v4958_v30  ;;  %vm2911_vm2 = vcmp.ge.f32.partialorder %v4864_v19, %v4958_v30  ;;  %v2802_v16 = vsub.f32 %v4856_v36, %v4958_v30  ;;  %v2803_v18 = vsub.f32 %v4864_v19, %v4958_v30 }
 0x89d   :  { %v2926_v55 = vsel %vm2910_vm1, %v4956_v28, 256  ;;  %v2927_v15 = vsel %vm2911_vm2, %v4961_v35, 256 }
 0x89e   :  { %vm2942_vm4 = vcmp.lt.s32.totalorder %v2926_v55, %v2927_v15 }
 0x89f   :  { %v4969_v9 = vpop.xlane.xlu0 %2782  ;;  %v4985_v39 = vsel %vm2942_vm4, %v2926_v55, %v2927_v15  ;;  %v2818_v55 = vmul.f32 1.442695, %v2802_v16 }
 0x8a0   :  { %vm2912_vm3 = vcmp.ge.f32.partialorder %v4871_v49, %v4969_v9  ;;  %vm2913_vm5 = vcmp.ge.f32.partialorder %v4881_v53, %v4969_v9  ;;  %v2945_v14 = vshra.s32 %v4985_v39, 16  ;;  %v2804_v22 = vsub.f32 %v4871_v49, %v4969_v9 }
 0x8a1   :  { %v2928_v37 = vsel %vm2912_vm3, %v4956_v28, 256  ;;  %v2929_v44 = vsel %vm2913_vm5, %v4961_v35, 256  ;;  %v2805_v24 = vsub.f32 %v4881_v53, %v4969_v9  ;;  %3857 = vpow2.f32 %v2818_v55 }
 0x8a2   :  { %vm2958_vm12 = vcmp.lt.s32.totalorder %v2928_v37, %v2929_v44  ;;  %v5051_v63 = vcvt.s32.f32 %v2945_v14 }
 0x8a3   :  { %v4967_v3 = vpop.xlane.xlu1 %2785  ;;  %v5032_v26 = vsel %vm2958_vm12, %v2928_v37, %v2929_v44  ;;  %v2820_v37 = vmul.f32 1.442695, %v2803_v18  ;;  %v2822_v44 = vmul.f32 1.442695, %v2804_v22 }
 0x8a4   :  { %vm2914_vm6 = vcmp.ge.f32.partialorder %v4888_v51, %v4967_v3  ;;  %vm2915_vm7 = vcmp.ge.f32.partialorder %v4897_v38, %v4967_v3  ;;  %v2806_v15 = vsub.f32 %v4888_v51, %v4967_v3 }
 0x8a5   :  { %v2930_v46 = vsel %vm2914_vm6, %v4956_v28, 256  ;;  %v2931_v40 = vsel %vm2915_vm7, %v4961_v35, 256  ;;  %3859 = vpow2.f32 %v2820_v37 }
 0x8a6   :  { %vm2974_vm13 = vcmp.lt.s32.totalorder %v2930_v46, %v2931_v40  ;;  %v2826_v19 = vmul.f32 1.442695, %v2806_v15  ;;  %3861 = vpow2.f32 %v2822_v44 }
 0x8a7   :  { %v4981_v23 = vpop.xlane.xlu1 %2788  ;;  %v5034_v33 = vsel %vm2974_vm13, %v2930_v46, %v2931_v40  ;;  %v2824_v46 = vmul.f32 1.442695, %v2805_v24 }
 0x8a8   :  { %vm2916_vm8 = vcmp.ge.f32.partialorder %v4904_v59, %v4981_v23  ;;  %vm2917_vm9 = vcmp.ge.f32.partialorder %v4913_v54, %v4981_v23  ;;  %v2977_v45 = vshra.s32 %v5034_v33, 16  ;;  %v2808_v36 = vsub.f32 %v4904_v59, %v4981_v23 }
 0x8a9   :  { %v2932_v32 = vsel %vm2916_vm8, %v4956_v28, 256  ;;  %v2933_v42 = vsel %vm2917_vm9, %v4961_v35, 256  ;;  %v2809_v49 = vsub.f32 %v4913_v54, %v4981_v23  ;;  %3863 = vpow2.f32 %v2824_v46 }
 0x8aa   :  { %vm2990_vm0 = vcmp.lt.s32.totalorder %v2932_v32, %v2933_v42  ;;  %v5062_v29 = vcvt.s32.f32 %v2977_v45  ;;  %v2830_v51 = vmul.f32 1.442695, %v2808_v36  ;;  %3865 = vpow2.f32 %v2826_v19 }
 0x8ab   :  { %v4983_v25 = vpop.xlane.xlu0 %2791  ;;  %v5055_v7 = vsel %vm2990_vm0, %v2932_v32, %v2933_v42  ;;  %v2832_v59 = vmul.f32 1.442695, %v2809_v49 }
 0x8ac   :  { %vm2918_vm10 = vcmp.ge.f32.partialorder %v4920_v57, %v4983_v25  ;;  %vm2919_vm11 = vcmp.ge.f32.partialorder %v4929_v21, %v4983_v25  ;;  %v2993_v5 = vshra.s32 %v5055_v7, 16  ;;  %v2810_v30 = vsub.f32 %v4920_v57, %v4983_v25 }
 0x8ad   :  { %v2934_v50 = vsel %vm2918_vm10, %v4956_v28, 256  ;;  %v2935_v56 = vsel %vm2919_vm11, %v4961_v35, 256 }
 0x8ae   :  { %vm3006_vm1 = vcmp.lt.s32.totalorder %v2934_v50, %v2935_v56  ;;  %v5070_v4 = vcvt.s32.f32 %v2993_v5  ;;  %v2834_v54 = vmul.f32 1.442695, %v2810_v30 }
 0x8af   :  { %v5002_v1 = vpop.xlane.xlu1 %2794  ;;  %v5057_v60 = vsel %vm3006_vm1, %v2934_v50, %v2935_v56  ;;  %v3858_v50 = vpop.eup %3857  ;;  %vm2898_vm1 = vcmask 7168  }
 0x8b0   :  { %vm2920_vm14 = vcmp.ge.f32.partialorder %v4936_v41, %v5002_v1  ;;  %vm2921_vm15 = vcmp.ge.f32.partialorder %v4945_v10, %v5002_v1  ;;  %v3009_v48 = vshra.s32 %v5057_v60, 16  ;;  %v2813_v9 = vsub.f32 %v4945_v10, %v5002_v1 }
 0x8b1   :  { %v2937_v0 = vsel %vm2921_vm15, %v4961_v35, 256 }
 0x8b2   :  { %v5072_v31 = vcvt.s32.f32 %v3009_v48 }
 0x8e8   :  { %v2753_v17 = vpop.f32.mrf.mxu0 }
 0x8e9   :  { %v5000_v47 = vadd.f32 %v2753_v17, %v4850_v13  ;;  %v2807_v17 = vsub.f32 %v4897_v38, %v4967_v3  ;;  %v2811_v38 = vsub.f32 %v4929_v21, %v4983_v25  ;;  %v2812_v3 = vsub.f32 %v4936_v41, %v5002_v1 }
 0x8ea   :  { %v2755_v8 = vpop.f32.mrf.mxu0  ;;  %v2840_v21 = vmul.f32 1.442695, %v2813_v9 }
 0x8eb   :  { %2774 = vst [vmem:[%s5248_s8 + $0x60] sm:$0xff] %v5000_v47  ;;  %v5009_v52 = vadd.f32 %v2755_v8, %v4853_v34  ;;  %v2828_v53 = vmul.f32 1.442695, %v2807_v17  ;;  %v2836_v23 = vmul.f32 1.442695, %v2811_v38 }
 0x8ec   :  { %v2757_v20 = vpop.f32.mrf.mxu0  ;;  %v2838_v40 = vmul.f32 1.442695, %v2812_v3 }
 0x8ed   :  { %2775 = vst [vmem:[%s5248_s8 + $0x68] sm:$0xff] %v5009_v52  ;;  %v5028_v43 = vadd.f32 %v2757_v20, %v4850_v13  ;;  %v2796_v27 = vmax.f32 %v5000_v47, %v5009_v52  ;;  %v2936_v13 = vsel %vm2920_vm14, %v4956_v28, 256  ;;  %3867 = vpow2.f32 %v2828_v53 }
 0x8ee   :  { %v2759_v11 = vpop.f32.mrf.mxu0  ;;  %vm3022_vm2 = vcmp.lt.s32.totalorder %v2936_v13, %v2937_v0  ;;  %3869 = vpow2.f32 %v2830_v51  ;;  %v2944_v53 = vand.u32 65535, %v4985_v39 }
 0x8ef   :  { %2776 = vst [vmem:[%s5248_s8 + $0x70] sm:$0xff] %v5028_v43  ;;  %v5041_v2 = vadd.f32 %v2759_v11, %v4853_v34  ;;  %2797 = vmax.xlane.f32.xlu0 %v2796_v27  ;;  %v2961_v34 = vshra.s32 %v5032_v26, 16  ;;  %v5066_v62 = vsel %vm3022_vm2, %v2936_v13, %v2937_v0  ;;  %3871 = vpow2.f32 %v2832_v59  ;;  %v3860_v13 = vpop.eup %3859 }
 0x8f0   :  { %v3025_v6 = vshra.s32 %v5066_v62, 16  ;;  %3873 = vpow2.f32 %v2834_v54  ;;  %v2946_v9 = vcvt.s32.f32 %v2944_v53  ;;  %v2960_v54 = vand.u32 65535, %v5032_v26 }
 0x8f1   :  { %2777 = vst [vmem:[%s5248_s8 + $0x78] sm:$0xff] %v5041_v2  ;;  %v2799_v58 = vmax.f32 %v5028_v43, %v5041_v2  ;;  %v5060_v61 = vcvt.s32.f32 %v2961_v34  ;;  %3875 = vpow2.f32 %v2836_v23  ;;  %v3862_v34 = vpop.eup %3861  ;;  %v2976_v23 = vand.u32 65535, %v5034_v33 }
 0x8f2   :  { %v5077_v12 = vcvt.s32.f32 %v3025_v6  ;;  %3877 = vpow2.f32 %v2838_v40  ;;  %v3864_v45 = vpop.eup %3863  ;;  %v2992_v26 = vand.u32 65535, %v5055_v7  ;;  %v3008_v33 = vand.u32 65535, %v5057_v60 }
 0x8f3   :  { %2800 = vmax.xlane.f32.xlu1 %v2799_v58  ;;  %2948 = vmin.xlane.f32.xlu0 %v5051_v63  ;;  %3879 = vpow2.f32 %v2840_v21  ;;  %v3866_v5 = vpop.eup %3865  ;;  %v2853_v22 = vadd.f32 %v3864_v45, %v3862_v34 }
 0x8f7   :  { %2964 = vmin.xlane.f32.xlu1 %v5060_v61  ;;  %2980 = vmin.xlane.f32.xlu0 %v5062_v29 }
 0x8fa   :  { %v3868_v48 = vpop.eup %3867 }
 0x8fb   :  { %2996 = vmin.xlane.f32.xlu1 %v5070_v4  ;;  %3012 = vmin.xlane.f32.xlu0 %v5072_v31  ;;  %v3870_v6 = vpop.eup %3869  ;;  %v2856_v24 = vadd.f32 %v3868_v48, %v3866_v5 }
 0x8fc   :  { %v3872_v16 = vpop.eup %3871 }
 0x8fd   :  { %v3874_v18 = vpop.eup %3873  ;;  %v2859_v36 = vadd.f32 %v3872_v16, %v3870_v6 }
 0x8fe   :  { %v3876_v55 = vpop.eup %3875 }
 0x8ff   :  { %3028 = vmin.xlane.f32.xlu1 %v5077_v12  ;;  %v3878_v15 = vpop.eup %3877  ;;  %v2862_v46 = vadd.f32 %v3876_v55, %v3874_v18 }
 0x900   :  { %v3880_v37 = vpop.eup %3879 }
 0x901   :  { %v2865_v51 = vadd.f32 %v3880_v37, %v3878_v15 }
 0x978   :  { %v2798_v57 = vpop.xlane.xlu0 %2797 }
 0x979   :  { %v2814_v8 = vsub.f32 %v5000_v47, %v2798_v57  ;;  %v2815_v14 = vsub.f32 %v5009_v52, %v2798_v57  ;;  %vm2922_vm3 = vcmp.ge.f32.partialorder %v5000_v47, %v2798_v57  ;;  %vm2923_vm4 = vcmp.ge.f32.partialorder %v5009_v52, %v2798_v57 }
 0x97a   :  { %v2938_v41 = vsel %vm2922_vm3, %v4956_v28, 256  ;;  %v2939_v10 = vsel %vm2923_vm4, %v4961_v35, 256 }
 0x97b   :  { %v2842_v25 = vmul.f32 1.442695, %v2814_v8  ;;  %vm3038_vm5 = vcmp.lt.s32.totalorder %v2938_v41, %v2939_v10  ;;  %v2844_v1 = vmul.f32 1.442695, %v2815_v14  ;;  %v2978_v14 = vcvt.s32.f32 %v2976_v23 }
 0x97c   :  { %v2801_v20 = vpop.xlane.xlu1 %2800  ;;  %v5110_v32 = vsel %vm3038_vm5, %v2938_v41, %v2939_v10  ;;  %v5128_v17 = vpop.xlane.xlu0 %2948  ;;  %v3010_v10 = vcvt.s32.f32 %v3008_v33 }
 0x97d   :  { %v2816_v42 = vsub.f32 %v5028_v43, %v2801_v20  ;;  %v2817_v47 = vsub.f32 %v5041_v2, %v2801_v20  ;;  %vm2924_vm6 = vcmp.ge.f32.partialorder %v5028_v43, %v2801_v20  ;;  %vm2925_vm7 = vcmp.ge.f32.partialorder %v5041_v2, %v2801_v20 }
 0x97e   :  { %v3041_v52 = vshra.s32 %v5110_v32, 16  ;;  %3881 = vpow2.f32 %v2842_v25  ;;  %v2940_v27 = vsel %vm2924_vm6, %v4956_v28, 256  ;;  %v2941_v11 = vsel %vm2925_vm7, %v4961_v35, 256 }
 0x97f   :  { %v2846_v56 = vmul.f32 1.442695, %v2816_v42  ;;  %3883 = vpow2.f32 %v2844_v1  ;;  %v2848_v0 = vmul.f32 1.442695, %v2817_v47  ;;  %vm3054_vm8 = vcmp.lt.s32.totalorder %v2940_v27, %v2941_v11 }
 0x980   :  { %v5119_v58 = vcvt.s32.f32 %v3041_v52  ;;  %v5121_v43 = vsel %vm3054_vm8, %v2940_v27, %v2941_v11  ;;  %v2850_v35 = vadd.f32 %v3860_v13, %v3858_v50  ;;  %v5130_v49 = vpop.xlane.xlu1 %2964  ;;  %v5133_v59 = vpop.xlane.xlu0 %2980  ;;  %vm2950_vm9 = vcmp.eq.f32.partialorder %v5051_v63, %v5128_v17 }
 0x981   :  { %v3057_v2 = vshra.s32 %v5121_v43, 16  ;;  %3885 = vpow2.f32 %v2846_v56  ;;  %v2951_v39 = vsel %vm2950_vm9, %v2946_v9, inf  ;;  %vm2966_vm10 = vcmp.eq.f32.partialorder %v5060_v61, %v5130_v49 }
 0x982   :  { %3044 = vmin.xlane.f32.xlu0 %v5119_v58  ;;  %3887 = vpow2.f32 %v2848_v0  ;;  %vm2982_vm11 = vcmp.eq.f32.partialorder %v5062_v29, %v5133_v59  ;;  %v2962_v63 = vcvt.s32.f32 %v2960_v54  ;;  %v2994_v29 = vcvt.s32.f32 %v2992_v26 }
 0x983   :  { %v5125_v28 = vcvt.s32.f32 %v3057_v2  ;;  %v2983_v41 = vsel %vm2982_vm11, %v2978_v14, inf  ;;  %v3024_v25 = vand.u32 65535, %v5066_v62  ;;  %v3056_v47 = vand.u32 65535, %v5121_v43 }
 0x984   :  { %v5139_v57 = vpop.xlane.xlu1 %2996  ;;  %v5145_v8 = vpop.xlane.xlu0 %3012  ;;  %v2967_v21 = vsel %vm2966_vm10, %v2962_v63, inf  ;;  %v2955_v0 = vcvt.f32.s32 %v5128_v17  ;;  %v2971_v5 = vcvt.f32.s32 %v5130_v49 }
 0x985   :  { %3060 = vmin.xlane.f32.xlu1 %v5125_v28  ;;  %vm2998_vm12 = vcmp.eq.f32.partialorder %v5070_v4, %v5139_v57  ;;  %vm3014_vm13 = vcmp.eq.f32.partialorder %v5072_v31, %v5145_v8  ;;  %v3026_v60 = vcvt.s32.f32 %v3024_v25  ;;  %v3040_v4 = vand.u32 65535, %v5110_v32 }
 0x986   :  { %2851 = vadd.xlane.f32.xlu0 %v2850_v35  ;;  %v2999_v1 = vsel %vm2998_vm12, %v2994_v29, inf  ;;  %v3015_v7 = vsel %vm3014_vm13, %v3010_v10, inf  ;;  %v3058_v56 = vcvt.s32.f32 %v3056_v47  ;;  %v2956_v2 = vshll.u32 %v2955_v0, 16 }
 0x987   :  { %v3042_v31 = vcvt.s32.f32 %v3040_v4  ;;  %v2987_v35 = vcvt.f32.s32 %v5133_v59  ;;  %v2972_v15 = vshll.u32 %v2971_v5, 16  ;;  %v3003_v37 = vcvt.f32.s32 %v5139_v57 }
 0x988   :  { %v5153_v61 = vpop.xlane.xlu1 %3028  ;;  %v3019_v17 = vcvt.f32.s32 %v5145_v8 }
 0x989   :  { %2854 = vadd.xlane.f32.xlu1 %v2853_v22  ;;  %vm3030_vm14 = vcmp.eq.f32.partialorder %v5077_v12, %v5153_v61  ;;  %v3004_v23 = vshll.u32 %v3003_v37, 16  ;;  %v3035_v63 = vcvt.f32.s32 %v5153_v61 }
 0x98a   :  { %2857 = vadd.xlane.f32.xlu0 %v2856_v24  ;;  %v3031_v20 = vsel %vm3030_vm14, %v3026_v60, inf }
 0x98b   :  { %v3882_v44 = vpop.eup %3881  ;;  %v3036_v60 = vshll.u32 %v3035_v63, 16 }
 0x98c   :  { %v3884_v19 = vpop.eup %3883 }
 0x98d   :  { %2860 = vadd.xlane.f32.xlu1 %v2859_v36  ;;  %v2868_v38 = vadd.f32 %v3884_v19, %v3882_v44  ;;  %v2988_v19 = vshll.u32 %v2987_v35, 16 }
 0x98e   :  { %2863 = vadd.xlane.f32.xlu0 %v2862_v46  ;;  %v3886_v30 = vpop.eup %3885 }
 0x98f   :  { %v3888_v3 = vpop.eup %3887 }
 0x990   :  { %v2871_v40 = vadd.f32 %v3888_v3, %v3886_v30 }
 0x991   :  { %2866 = vadd.xlane.f32.xlu1 %v2865_v51 }
 0x992   :  { %2869 = vadd.xlane.f32.xlu0 %v2868_v38 }
 0x995   :  { %2872 = vadd.xlane.f32.xlu1 %v2871_v40  ;;  %v3020_v40 = vshll.u32 %v3019_v17, 16 }
 0x996   :  { %2952 = vmin.xlane.f32.xlu0 %v2951_v39 }
 0x999   :  { %2968 = vmin.xlane.f32.xlu1 %v2967_v21 }
 0x99a   :  { %2984 = vmin.xlane.f32.xlu0 %v2983_v41 }
 0x99d   :  { %3000 = vmin.xlane.f32.xlu1 %v2999_v1 }
 0x99e   :  { %3016 = vmin.xlane.f32.xlu0 %v3015_v7 }
 0x9a1   :  { %3032 = vmin.xlane.f32.xlu1 %v3031_v20 }
 0xa0b   :  { %v5159_v42 = vpop.xlane.xlu0 %3044 }
 0xa0c   :  { %vm3046_vm15 = vcmp.eq.f32.partialorder %v5119_v58, %v5159_v42 }
 0xa0d   :  { %v3047_v62 = vsel %vm3046_vm15, %v3042_v31, inf }
 0xa0e   :  { %3048 = vmin.xlane.f32.xlu0 %v3047_v62  ;;  %v5164_v52 = vpop.xlane.xlu1 %3060 }
 0xa0f   :  { %v2852_v50 = vpop.xlane.xlu0 %2851  ;;  %vm3062_vm0 = vcmp.eq.f32.partialorder %v5125_v28, %v5164_v52 }
 0xa10   :  { %3889 = vlog2.f32 %v2852_v50  ;;  %v3063_v12 = vsel %vm3062_vm0, %v3058_v56, inf }
 0xa11   :  { %3064 = vmin.xlane.f32.xlu1 %v3063_v12  ;;  %v3051_v12 = vcvt.f32.s32 %v5159_v42 }
 0xa12   :  { %v2855_v32 = vpop.xlane.xlu1 %2854 }
 0xa13   :  { %v2858_v27 = vpop.xlane.xlu0 %2857  ;;  %3891 = vlog2.f32 %v2855_v32 }
 0xa14   :  { %3893 = vlog2.f32 %v2858_v27  ;;  %v3052_v27 = vshll.u32 %v3051_v12, 16 }
 0xa16   :  { %v2861_v11 = vpop.xlane.xlu1 %2860 }
 0xa17   :  { %v2864_v13 = vpop.xlane.xlu0 %2863  ;;  %3895 = vlog2.f32 %v2861_v11  ;;  %v3067_v11 = vcvt.f32.s32 %v5164_v52 }
 0xa18   :  { %3897 = vlog2.f32 %v2864_v13 }
 0xa1a   :  { %v2867_v58 = vpop.xlane.xlu1 %2866 }
 0xa1b   :  { %v2870_v34 = vpop.xlane.xlu0 %2869  ;;  %3899 = vlog2.f32 %v2867_v58 }
 0xa1c   :  { %3901 = vlog2.f32 %v2870_v34  ;;  %v3068_v34 = vshll.u32 %v3067_v11, 16 }
 0xa1d   :  { %v3890_v43 = vpop.eup %3889 }
 0xa1e   :  { %v2875_v45 = vmul.f32 0.6931472, %v3890_v43  ;;  %v2873_v48 = vpop.xlane.xlu1 %2872 }
 0xa1f   :  { %v2953_v28 = vpop.xlane.xlu0 %2952  ;;  %3903 = vlog2.f32 %v2873_v48 }
 0xa20   :  { %v2890_v6 = vsub.f32 0.0, %v2875_v45  ;;  %v2954_v16 = vcvt.f32.s32 %v2953_v28  ;;  %v3892_v18 = vpop.eup %3891 }
 0xa21   :  { %v3894_v22 = vpop.eup %3893  ;;  %v2877_v24 = vmul.f32 0.6931472, %v3892_v18 }
 0xa22   :  { %2899 = vst.msk [vmem:[%s5249_s10] sm:$0xff] %vm2898_vm1, %v2890_v6  ;;  %v2957_v55 = vadd.s32 %v2956_v2, %v2954_v16  ;;  %v2879_v44 = vmul.f32 0.6931472, %v3894_v22  ;;  %v2969_v36 = vpop.xlane.xlu1 %2968 }
 0xa23   :  { %v2985_v46 = vpop.xlane.xlu0 %2984  ;;  %v2891_v49 = vsub.f32 0.0, %v2877_v24  ;;  %v2970_v53 = vcvt.f32.s32 %v2969_v36 }
 0xa24   :  { %3070 = vst.msk [vmem:[%s5250_s9] sm:$0xff] %vm2898_vm1, %v2957_v55  ;;  %v2986_v30 = vcvt.f32.s32 %v2985_v46  ;;  %v3896_v51 = vpop.eup %3895  ;;  %v2892_v38 = vsub.f32 0.0, %v2879_v44 }
 0xa25   :  { %v3898_v3 = vpop.eup %3897  ;;  %2900 = vst.msk [vmem:[%s5249_s10 + $0x8] sm:$0xff] %vm2898_vm1, %v2891_v49  ;;  %v2881_v59 = vmul.f32 0.6931472, %v3896_v51  ;;  %v2973_v9 = vadd.s32 %v2972_v15, %v2970_v53 }
 0xa26   :  { %v2989_v54 = vadd.s32 %v2988_v19, %v2986_v30  ;;  %2901 = vst.msk [vmem:[%s5249_s10 + $0x10] sm:$0xff] %vm2898_vm1, %v2892_v38  ;;  %v2883_v57 = vmul.f32 0.6931472, %v3898_v3  ;;  %v3001_v39 = vpop.xlane.xlu1 %3000 }
 0xa27   :  { %v3017_v8 = vpop.xlane.xlu0 %3016  ;;  %v2893_v14 = vsub.f32 0.0, %v2881_v59  ;;  %3071 = vst.msk [vmem:[%s5250_s9 + $0x8] sm:$0xff] %vm2898_vm1, %v2973_v9  ;;  %v3002_v26 = vcvt.f32.s32 %v3001_v39 }
 0xa28   :  { %3072 = vst.msk [vmem:[%s5250_s9 + $0x10] sm:$0xff] %vm2898_vm1, %v2989_v54  ;;  %v3018_v33 = vcvt.f32.s32 %v3017_v8  ;;  %v3900_v21 = vpop.eup %3899  ;;  %v2894_v41 = vsub.f32 0.0, %v2883_v57 }
 0xa29   :  { %v3902_v29 = vpop.eup %3901  ;;  %2902 = vst.msk [vmem:[%s5249_s10 + $0x18] sm:$0xff] %vm2898_vm1, %v2893_v14  ;;  %v2885_v61 = vmul.f32 0.6931472, %v3900_v21  ;;  %v3005_v10 = vadd.s32 %v3004_v23, %v3002_v26 }
 0xa2a   :  { %v3021_v25 = vadd.s32 %v3020_v40, %v3018_v33  ;;  %2903 = vst.msk [vmem:[%s5249_s10 + $0x20] sm:$0xff] %vm2898_vm1, %v2894_v41  ;;  %v2887_v1 = vmul.f32 0.6931472, %v3902_v29  ;;  %v3033_v7 = vpop.xlane.xlu1 %3032 }
 0xa2b   :  { %v2895_v20 = vsub.f32 0.0, %v2885_v61  ;;  %3073 = vst.msk [vmem:[%s5250_s9 + $0x18] sm:$0xff] %vm2898_vm1, %v3005_v10  ;;  %v3034_v4 = vcvt.f32.s32 %v3033_v7 }
 0xa2c   :  { %3074 = vst.msk [vmem:[%s5250_s9 + $0x20] sm:$0xff] %vm2898_vm1, %v3021_v25  ;;  %v3904_v31 = vpop.eup %3903  ;;  %v2896_v47 = vsub.f32 0.0, %v2887_v1 }
 0xa2d   :  { %2904 = vst.msk [vmem:[%s5249_s10 + $0x28] sm:$0xff] %vm2898_vm1, %v2895_v20  ;;  %v2889_v62 = vmul.f32 0.6931472, %v3904_v31  ;;  %v3037_v50 = vadd.s32 %v3036_v60, %v3034_v4 }
 0xa2e   :  { %2905 = vst.msk [vmem:[%s5249_s10 + $0x30] sm:$0xff] %vm2898_vm1, %v2896_v47 }
 0xa2f   :  { %v2897_v56 = vsub.f32 0.0, %v2889_v62  ;;  %3075 = vst.msk [vmem:[%s5250_s9 + $0x28] sm:$0xff] %vm2898_vm1, %v3037_v50 }
 0xa31   :  { %2906 = vst.msk [vmem:[%s5249_s10 + $0x38] sm:$0xff] %vm2898_vm1, %v2897_v56 }
 0xa97   :  { %v3049_v32 = vpop.xlane.xlu0 %3048 }
 0xa98   :  { %v3050_v13 = vcvt.f32.s32 %v3049_v32 }
 0xa9a   :  { %v3053_v0 = vadd.s32 %v3052_v27, %v3050_v13  ;;  %v3065_v58 = vpop.xlane.xlu1 %3064 }
 0xa9b   :  { %v3066_v43 = vcvt.f32.s32 %v3065_v58 }
 0xa9c   :  { %3076 = vst.msk [vmem:[%s5250_s9 + $0x30] sm:$0xff] %vm2898_vm1, %v3053_v0 }
 0xa9d   :  { %v3069_v45 = vadd.s32 %v3068_v34, %v3066_v43 }
 0xa9f   :  { %3077 = vst.msk [vmem:[%s5250_s9 + $0x38] sm:$0xff] %vm2898_vm1, %v3069_v45 }

</bundles_post_ra>
